<compile_context>
chip_gen: v6e
topology: v6e:2x2x1
jax: 0.10.0
libtpu: 0.0.40
codegen_flags: <defaults>
</compile_context>

<pallas_src>
import jax
import jax.numpy as jnp
from jax.experimental import pallas as pl
from jax.experimental.pallas import tpu as pltpu


def _round_up(n, m):
    return ((n + m - 1) // m) * m


def _vmem_limit_bytes():
    """Generation-aware VMEM budget: ~3/4 of physical VMEM (96 MiB on
    v5e/v6e's 128 MiB, 48 MiB on v7x's 64 MiB).  Conservative 48 MiB
    fallback if the hardware query is unavailable."""
    try:
        cap = int(pltpu.get_tpu_info().vmem_capacity_bytes)
    except Exception:
        cap = 64 * 1024 * 1024
    return min((cap // 4) * 3, 100 * 1024 * 1024)


# --------------------------------------------------------------------------
# Kernel A: streaming fc1.  grid = (h1-column block j [parallel], K tile k).
# --------------------------------------------------------------------------
def fc1_stream_kernel(x_ref, w1_ref, b1_ref, h1_ref, acc_ref):
    k = pl.program_id(1)

    @pl.when(k == 0)
    def _():
        acc_ref[...] = jnp.zeros_like(acc_ref)

    # x_ref is the full resident (nk, b_pad, tk) slab; pick this step's K tile.
    acc_ref[...] += jnp.dot(x_ref[k], w1_ref[...],
                            preferred_element_type=jnp.float32)

    @pl.when(k == pl.num_programs(1) - 1)
    def _():
        # fc1 bias + ReLU   (dropout -> identity, eval mode)
        h1_ref[...] = jnp.maximum(acc_ref[...] + b1_ref[...],
                                  0.0).astype(h1_ref.dtype)


# --------------------------------------------------------------------------
# Kernel B: tiny epilogue (fc2 + ReLU + fc3 + exact softmax), fully resident.
# --------------------------------------------------------------------------
def mlp_head_kernel(h1_ref, w2_ref, b2_ref, w3_ref, b3_ref, o_ref):
    # fc2 + ReLU        (dropout -> identity, eval mode)
    h2 = jnp.dot(h1_ref[...], w2_ref[...], preferred_element_type=jnp.float32)
    h2 = jnp.maximum(h2 + b2_ref[...], 0.0)

    # fc3 (output columns padded to 128 lanes; padded classes carry a -1e30
    # f32 bias so exp underflows to exactly 0).
    logits = jnp.dot(h2.astype(w3_ref.dtype), w3_ref[...],
                     preferred_element_type=jnp.float32) + b3_ref[...]

    # Numerically stable softmax over dim=1; exact divide so rows sum to 1.
    m = jnp.max(logits, axis=-1, keepdims=True)
    e = jnp.exp(logits - m)
    o_ref[...] = e / jnp.sum(e, axis=-1, keepdims=True)


# --------------------------------------------------------------------------
# One-time planning + weight preparation.
# --------------------------------------------------------------------------
def make_config(d_in, h1_dim, h2_dim, n_out, *, max_batch=16):
    """Plan pad / tile sizes once (shared by prepare_params and the forward)."""
    assert h1_dim % 128 == 0 and h2_dim % 128 == 0
    vmem_limit = _vmem_limit_bytes()

    # Split fc1's output columns in two (v7x 2-TC split; harmless elsewhere).
    n_h1 = 2 if (h1_dim % 256 == 0) else 1
    th1 = h1_dim // n_h1

    b_pad = _round_up(max(max_batch, 1), 16)      # bf16 packs 16 sublanes/vreg
    d128 = _round_up(d_in, 128)

    # K tile: largest tk whose double-buffered bf16 W1 slab fits the VMEM
    # budget, preferring an exact divisor of d128 (no padded tail tile).
    budget = (vmem_limit * 4) // 5
    resident = 2 * (b_pad * d128 * 2) + b_pad * th1 * 4 + (1 << 20)
    w1_budget = max(budget - resident, 512 * th1 * 4)
    tk_max_units = max(4, min(w1_budget // (512 * th1), 8192 // 128))

    units = d128 // 128
    cap = max(1, min(units, tk_max_units))
    best = 1
    for u in range(cap, 0, -1):
        if units % u == 0:
            best = u
            break
    if best * 128 >= 1024 or best == units:
        tk = best * 128                           # exact divisor, no tail
    else:
        tk = cap * 128                            # fall back to a padded tail
    nk = pl.cdiv(d128, tk)
    d_pad = nk * tk

    n_pad = max(128, _round_up(n_out, 128))       # lane-dense output stores

    return dict(d_in=d_in, h1_dim=h1_dim, h2_dim=h2_dim, n_out=n_out,
                b_pad=b_pad, d_pad=d_pad, tk=tk, nk=nk,
                n_h1=n_h1, th1=th1, n_pad=n_pad, vmem_limit=vmem_limit)


def prepare_params(params, cfg):
    """One-time conversion of f32 (in, out)-layout weights into kernel layout
    (bf16, padded).  Call at init — NOT per forward — so the forward never
    re-materializes the ~1.17 GB f32 W1."""
    d_pad, n_pad = cfg["d_pad"], cfg["n_pad"]
    d_in, n_out = cfg["d_in"], cfg["n_out"]
    w1 = jnp.pad(params["w1"], ((0, d_pad - d_in), (0, 0))).astype(jnp.bfloat16)
    w3 = jnp.pad(params["w3"], ((0, 0), (0, n_pad - n_out))).astype(jnp.bfloat16)
    b3 = jnp.pad(params["b3"].astype(jnp.float32),
                 ((0, 0), (0, n_pad - n_out)),
                 constant_values=-1e30)           # padded classes -> prob 0
    return dict(
        w1=w1,
        b1=params["b1"].astype(jnp.float32),
        w2=params["w2"].astype(jnp.bfloat16),
        b2=params["b2"].astype(jnp.float32),
        w3=w3,
        b3=b3,
    )


# --------------------------------------------------------------------------
# Forward pass.
# --------------------------------------------------------------------------
def action_predictor_forward(x, prepared, cfg):
    """x: (B, C, H, W) float32; prepared: output of prepare_params().
    Returns softmax probabilities (B, n_classes), matching
    ActionPredictor.forward in eval mode."""
    B = x.shape[0]
    x2d = x.reshape(B, -1)                        # == x.view(x.size(0), -1)
    assert x2d.shape[1] == cfg["d_in"]

    tk, nk, d_pad = cfg["tk"], cfg["nk"], cfg["d_pad"]
    n_h1, th1 = cfg["n_h1"], cfg["th1"]
    h1_dim, h2_dim = cfg["h1_dim"], cfg["h2_dim"]
    n_pad, n_out = cfg["n_pad"], cfg["n_out"]

    b_pad = _round_up(B, 16)                      # bf16 sublane packing

    x_p = jnp.pad(x2d, ((0, b_pad - B), (0, d_pad - cfg["d_in"])))
    x_p = x_p.astype(jnp.bfloat16)
    x3 = x_p.reshape(b_pad, nk, tk).transpose(1, 0, 2)   # (nk, b_pad, tk)

    w1, b1 = prepared["w1"], prepared["b1"]
    w2, b2 = prepared["w2"], prepared["b2"]
    w3, b3 = prepared["w3"], prepared["b3"]

    # ---- Kernel A: stream W1, accumulate fc1, fuse bias+ReLU on last step --
    fc1_cost = pl.CostEstimate(
        flops=int(2 * b_pad * d_pad * h1_dim),
        transcendentals=0,
        bytes_accessed=int(b_pad * d_pad * 2 + d_pad * h1_dim * 2
                           + h1_dim * 4 + b_pad * h1_dim * 2),
    )

    h1 = pl.pallas_call(
        fc1_stream_kernel,
        out_shape=jax.ShapeDtypeStruct((b_pad, h1_dim), jnp.bfloat16),
        grid_spec=pltpu.PrefetchScalarGridSpec(
            num_scalar_prefetch=0,
            grid=(n_h1, nk),
            in_specs=[
                pl.BlockSpec((nk, b_pad, tk), lambda j, k: (0, 0, 0)),  # x: resident
                pl.BlockSpec((tk, th1), lambda j, k: (k, j)),           # W1: streamed
                pl.BlockSpec((1, th1), lambda j, k: (0, j)),            # b1
            ],
            out_specs=pl.BlockSpec((b_pad, th1), lambda j, k: (0, j)),
            scratch_shapes=[pltpu.VMEM((b_pad, th1), jnp.float32)],     # fc1 accum
        ),
        compiler_params=pltpu.CompilerParams(
            dimension_semantics=("parallel", "arbitrary"),  # h1 split / K reduce
            vmem_limit_bytes=cfg["vmem_limit"],
        ),
        cost_estimate=fc1_cost,
    )(x3, w1, b1)

    # ---- Kernel B: tiny epilogue (fc2 + ReLU + fc3 + softmax) --------------
    head_cost = pl.CostEstimate(
        flops=int(2 * b_pad * (h1_dim * h2_dim + h2_dim * n_pad)),
        transcendentals=int(b_pad * n_pad),
        bytes_accessed=int(b_pad * h1_dim * 2 + h1_dim * h2_dim * 2
                           + h2_dim * 4 + h2_dim * n_pad * 2 + n_pad * 4
                           + b_pad * n_pad * 4),
    )

    probs = pl.pallas_call(
        mlp_head_kernel,
        out_shape=jax.ShapeDtypeStruct((b_pad, n_pad), jnp.float32),
        grid_spec=pltpu.PrefetchScalarGridSpec(
            num_scalar_prefetch=0,
            grid=(1,),
            in_specs=[
                pl.BlockSpec((b_pad, h1_dim), lambda i: (0, 0)),
                pl.BlockSpec((h1_dim, h2_dim), lambda i: (0, 0)),
                pl.BlockSpec((1, h2_dim), lambda i: (0, 0)),
                pl.BlockSpec((h2_dim, n_pad), lambda i: (0, 0)),
                pl.BlockSpec((1, n_pad), lambda i: (0, 0)),
            ],
            out_specs=pl.BlockSpec((b_pad, n_pad), lambda i: (0, 0)),
        ),
        compiler_params=pltpu.CompilerParams(
            dimension_semantics=("arbitrary",),
        ),
        cost_estimate=head_cost,
    )(h1, w2, b2, w3, b3)

    return probs[:B, :n_out]


def init_linear(key, fan_in, fan_out):
    """PyTorch nn.Linear default init: U(-1/sqrt(fan_in), 1/sqrt(fan_in)).
    Weight returned pre-transposed to (fan_in, fan_out)."""
    kw, kb = jax.random.split(key)
    bound = 1.0 / (fan_in ** 0.5)
    w = jax.random.uniform(kw, (fan_in, fan_out), jnp.float32, -bound, bound)
    b = jax.random.uniform(kb, (1, fan_out), jnp.float32, -bound, bound)
    return w, b


if __name__ == "__main__":
    # Small shapes consistent with the module's structure:
    #   real: (B, 2048, 7, 10) -> 143360 -> 2048 -> 1024 -> 11
    #   demo: (B,   32, 7, 10) ->   2240 ->  512 ->  256 -> 11
    B, C, H, W = 2, 32, 7, 10
    D_IN = C * H * W          # 2240
    H1, H2, N_CLASSES = 512, 256, 11

    root = jax.random.PRNGKey(0)
    kx, k1, k2, k3 = jax.random.split(root, 4)

    x = jax.random.normal(kx, (B, C, H, W), jnp.float32)

    w1, b1 = init_linear(k1, D_IN, H1)
    w2, b2 = init_linear(k2, H1, H2)
    w3, b3 = init_linear(k3, H2, N_CLASSES)
    params = {"w1": w1, "b1": b1, "w2": w2, "b2": b2, "w3": w3, "b3": b3}

    # One-time planning + weight conversion to kernel layout (NOT per call).
    cfg = make_config(D_IN, H1, H2, N_CLASSES, max_batch=B)
    prepared = prepare_params(params, cfg)
    prepared = jax.tree_util.tree_map(jax.block_until_ready, prepared)

    out = action_predictor_forward(x, prepared, cfg)
    out = jax.block_until_ready(out)

    # Pure-JAX reference with the same bf16-weight / f32-accumulation numerics.
    # (Not a faithful f32 comparison to the PyTorch module — bf16 weights
    #  shift logits at the ~1e-2 level by design, for HBM bandwidth.)
    x2d = x.reshape(B, -1).astype(jnp.bfloat16)
    w1b, w2b, w3b = (w.astype(jnp.bfloat16) for w in (w1, w2, w3))
    r = jnp.maximum(jnp.dot(x2d, w1b, preferred_element_type=jnp.float32) + b1, 0.0)
    r = jnp.maximum(jnp.dot(r.astype(jnp.bfloat16), w2b,
                            preferred_element_type=jnp.float32) + b2, 0.0)
    r = jnp.dot(r.astype(jnp.bfloat16), w3b,
                preferred_element_type=jnp.float32) + b3
    ref = jax.nn.softmax(r, axis=1)

    assert out.shape == (B, N_CLASSES)
    assert bool(jnp.allclose(out, ref, atol=5e-3, rtol=5e-3))
    assert bool(jnp.allclose(jnp.sum(out, axis=1), 1.0, atol=1e-3))

    print("KERNEL_OK")
</pallas_src>

<mosaic_0001>
module attributes {stable_mosaic.version = 11 : i64} {
  func.func @fc1_stream_kernel(%arg0: i32, %arg1: i32, %arg2: memref<1x16x2304xbf16, #tpu.memory_space<vmem>>, %arg3: memref<2304x256xbf16, #tpu.memory_space<vmem>>, %arg4: memref<1x256xf32, #tpu.memory_space<vmem>>, %arg5: memref<16x256xbf16, #tpu.memory_space<vmem>>, %arg6: memref<16x256xf32, #tpu.memory_space<vmem>>) attributes {dimension_semantics = [#tpu.dimension_semantics<parallel>, #tpu.dimension_semantics<arbitrary>], iteration_bounds = array<i64: 2, 1>, scalar_prefetch = 0 : i64, scratch_operands = 1 : i64, tpu.core_type = #tpu.core_type<tc>, window_params = [{pipeline_mode = #tpu.pipeline_mode<synchronous>, transform_indices = @transform_0, window_bounds = array<i64: 1, 16, 2304>}, {transform_indices = @transform_1, window_bounds = array<i64: 2304, 256>}, {transform_indices = @transform_2, window_bounds = array<i64: 1, 256>}, {transform_indices = @transform_3, window_bounds = array<i64: 16, 256>}]} {
    %c0_i32 = arith.constant 0 : i32
    %0 = arith.cmpi eq, %arg1, %c0_i32 : i32
    %1 = arith.extui %0 : i1 to i32
    %c0_i32_0 = arith.constant 0 : i32
    %2 = arith.cmpi ne, %1, %c0_i32_0 : i32
    scf.if %2 {
      %cst_10 = arith.constant 0.000000e+00 : f32
      %14 = vector.broadcast %cst_10 : f32 to vector<16x256xf32>
      %c0_11 = arith.constant 0 : index
      %c0_12 = arith.constant 0 : index
      %15 = vector.load %arg6[%c0_11, %c0_12] : memref<16x256xf32, #tpu.memory_space<vmem>>, vector<16x256xf32>
      tpu.vector_store %arg6[%c0_11, %c0_12], %14 {strides = array<i32>} : memref<16x256xf32, #tpu.memory_space<vmem>>, vector<16x256xf32>,
    } else {
    }
    %c0 = arith.constant 0 : index
    %c0_1 = arith.constant 0 : index
    %3 = vector.load %arg6[%c0, %c0_1] : memref<16x256xf32, #tpu.memory_space<vmem>>, vector<16x256xf32>
    %4 = arith.index_cast %arg1 : i32 to index
    %c0_2 = arith.constant 0 : index
    %c0_3 = arith.constant 0 : index
    %5 = vector.load %arg2[%4, %c0_2, %c0_3] : memref<1x16x2304xbf16, #tpu.memory_space<vmem>>, vector<1x16x2304xbf16>
    %6 = vector.shape_cast %5 : vector<1x16x2304xbf16> to vector<16x2304xbf16>
    %c0_4 = arith.constant 0 : index
    %c0_5 = arith.constant 0 : index
    %7 = vector.load %arg3[%c0_4, %c0_5] : memref<2304x256xbf16, #tpu.memory_space<vmem>>, vector<2304x256xbf16>
    %cst = arith.constant dense<0.000000e+00> : vector<16x256xf32>
    %8 = tpu.matmul %6, %7, %cst {dimension_numbers = #tpu.dot_dimension_numbers<[1], [0], [0], [1], [0, 0, 1, 1], [], []>} : vector<16x2304xbf16>, vector<2304x256xbf16>, vector<16x256xf32> -> vector<16x256xf32>
    %9 = arith.addf %3, %8 : vector<16x256xf32>
    %c0_6 = arith.constant 0 : index
    %c0_7 = arith.constant 0 : index
    %10 = vector.load %arg6[%c0_6, %c0_7] : memref<16x256xf32, #tpu.memory_space<vmem>>, vector<16x256xf32>
    tpu.vector_store %arg6[%c0_6, %c0_7], %9 {strides = array<i32>} : memref<16x256xf32, #tpu.memory_space<vmem>>, vector<16x256xf32>,
    %c0_i32_8 = arith.constant 0 : i32
    %11 = arith.cmpi eq, %arg1, %c0_i32_8 : i32
    %12 = arith.extui %11 : i1 to i32
    %c0_i32_9 = arith.constant 0 : i32
    %13 = arith.cmpi ne, %12, %c0_i32_9 : i32
    scf.if %13 {
      %c0_10 = arith.constant 0 : index
      %c0_11 = arith.constant 0 : index
      %14 = vector.load %arg6[%c0_10, %c0_11] : memref<16x256xf32, #tpu.memory_space<vmem>>, vector<16x256xf32>
      %c0_12 = arith.constant 0 : index
      %c0_13 = arith.constant 0 : index
      %15 = vector.load %arg4[%c0_12, %c0_13] : memref<1x256xf32, #tpu.memory_space<vmem>>, vector<1x256xf32>
      %16 = vector.broadcast %15 : vector<1x256xf32> to vector<16x256xf32>
      %17 = arith.addf %14, %16 : vector<16x256xf32>
      %cst_14 = arith.constant 0.000000e+00 : f32
      %18 = vector.broadcast %cst_14 : f32 to vector<16x256xf32>
      %19 = arith.maximumf %17, %18 : vector<16x256xf32>
      %20 = arith.truncf %19 : vector<16x256xf32> to vector<16x256xbf16>
      %c0_15 = arith.constant 0 : index
      %c0_16 = arith.constant 0 : index
      %21 = vector.load %arg5[%c0_15, %c0_16] : memref<16x256xbf16, #tpu.memory_space<vmem>>, vector<16x256xbf16>
      tpu.vector_store %arg5[%c0_15, %c0_16], %20 {strides = array<i32>} : memref<16x256xbf16, #tpu.memory_space<vmem>>, vector<16x256xbf16>,
    } else {
    }
    return
  }
  func.func @transform_0(%arg0: i32, %arg1: i32) -> (i32, i32, i32) {
    %c0_i32 = arith.constant 0 : i32
    %c0_i32_0 = arith.constant 0 : i32
    %c0_i32_1 = arith.constant 0 : i32
    %c0_i32_2 = arith.constant 0 : i32
    return %c0_i32, %c0_i32_0, %c0_i32_1 : i32, i32, i32
  }
  func.func @transform_1(%arg0: i32, %arg1: i32) -> (i32, i32) {
    %c0_i32 = arith.constant 0 : i32
    return %arg1, %arg0 : i32, i32
  }
  func.func @transform_2(%arg0: i32, %arg1: i32) -> (i32, i32) {
    %c0_i32 = arith.constant 0 : i32
    %c0_i32_0 = arith.constant 0 : i32
    return %c0_i32, %arg0 : i32, i32
  }
  func.func @transform_3(%arg0: i32, %arg1: i32) -> (i32, i32) {
    %c0_i32 = arith.constant 0 : i32
    %c0_i32_0 = arith.constant 0 : i32
    return %c0_i32, %arg0 : i32, i32
  }
}

</mosaic_0001>

<bundles_post_ra>
// kernel: tpu_custom_call.1
= control target key start
LH: loop header
LB: loop body
LE: loop exit
PB: predicated region body
PF: predicated region fallthrough
CT: control target
= control target key end

     0   :  { %8 = vsyncpa [#allocation4], 0  ;;  %s4249_s0 = inlined_call_operand.hbm [shape: bf16[1,16,2304], index: 0, kind: input, shape index: {}]   ;;  %s4250_s1 = inlined_call_operand.hbm [shape: bf16[2304,512], index: 1, kind: input, shape index: {}]   ;;  %s4251_s2 = inlined_call_operand.hbm [shape: f32[1,512], index: 2, kind: input, shape index: {}]   ;;  %s4252_s3 = inlined_call_operand.hbm [shape: bf16[16,512], index: 3, kind: output, shape index: {}]  }
   0x1   :  { %9 = vsyncpa [#allocation7], 0 }
   0x2   :  { %11 = vsyncpa [#allocation7 + $0x1], 0 }
   0x3   :  { %12 = vsyncpa [#allocation5], 0 }
   0x4   :  { %14 = vsyncpa [#allocation5 + $0x1], 0  ;;  %s3758_s12 = smov 0   ;;  %s3760_s13 = smov 0  }
   0x5   :  { %s3762_s14 = smov 0   ;;  %s3764_s15 = smov 0  }
   0x6   :  { %s3766_s16 = smov 0   ;;  %s3768_s17 = smov 0  }
   0x7 LB: > { %s32_s18 = sadd.s32 1, %s3720_s16  ;;  %s62_s19 = sadd.s32 1, %s3712_s14  ;;  %s3724_s17 = sphi %s3768_s17, %s20_s17   ;;  %s3720_s16 = sphi %s3766_s16, %s4272_s16   ;;  %s3716_s15 = sphi %s3764_s15, %s4271_s15   ;;  %s3712_s14 = sphi %s3762_s14, %s4270_s14   ;;  %s3708_s13 = sphi %s3760_s13, %s4269_s13   ;;  %s3704_s12 = sphi %s3758_s12, %s4268_s12  }
   0x8   : > { %p34_p0 = scmp.ge.s32.totalorder %s32_s18, 2  ;;  %p69_p1 = scmp.ne.s32.totalorder %s3712_s14, %s3708_s13 }
   0x9   : > { %p70_p2 = scmp.eq.s32.totalorder %s3724_s17, 0  ;;  %p3039_p5 = scmp.lt.s32.totalorder %s3724_s17, 2 }
   0xa   : > { %s4274_s18 = smov (%p34_p0, %s32_s18), 0  ;;  %s164_s21 = sand.u32 1, %s3724_s17  }
   0xb   : > { %p71_p4 = por %p70_p2, %p69_p1  ;;  %s58_s20 = ssub.s32 %s3720_s16, %s4274_s18 }
   0xc   : > { %p60_p6 = scmp.eq.s32.totalorder %s58_s20, 0  ;;  %s166_s22 = sand.u32 1, %s3712_s14  }
   0xd   : > { %s3006_s23 = sshll.u32 %s3720_s16, 7  ;;  %s3011_s25 = smul.u32 2304, %s166_s22 }
   0xe   : > { %s3806_s24 = scalar_select %p60_p6, %s3712_s14, %s62_s19  }
   0xf   : > { %s177_s28 = scalar_lea.hbm %s4250_s1, %s3006_s23  ;;  %p3813_p7 = pnand %p3039_p5, %p71_p4 }
  0x10   : > { %s168_s30 = scalar_lea.vmem [#allocation6], %s3011_s25  ;;  %s3817_s5 = scalar_lea.sflag [#allocation7], %s164_s21 }
  0x11   : > { %s178_s4 = sshll.u32 %s168_s30, 4  ;;  %p4254_p8 = pneg %p3813_p7  ;;  %s179_s4 = int_to_ptr.vmem [resolvable:$true] %s178_s4 }
  0x12   : > { %s3571_s6 = scalar_lea.vmem %s179_s4, 36864  ;;  %s3726_s7 = smov [#allocation6]  }
  0x13   : > { %p3572_p9 = scmp.ne.s32.totalorder %s179_s4, %s3571_s6  ;;  %s3576_s8 = sshll.u32 %s3726_s7, 4  ;;  %s3577_s8 = int_to_ptr.vmem [resolvable:$false] %s3576_s8 }
  0x14   : > { %s3578_s9 = scalar_lea.vmem %s3577_s8, 73728  ;;  %p3579_p12 = scmp.lt.s32.totalorder %s179_s4, %s3577_s8 }
  0x15   : > { %p3574_p10 = pnand %p3572_p9, %p4254_p8  ;;  %p3580_p13 = scmp.lt.s32.totalorder %s3578_s9, %s3571_s6 }
  0x17   : > { %p3575_p11 = pneg %p3574_p10  ;;  %p3581_p0 = por %p3580_p13, %p3579_p12 }
  0x19   : > { %p3582_p2 = pnand %p3581_p0, %p3575_p11 }
  0x1b   : > { %3585 = shalt.err (!%p3582_p2)
}
  0x1c   : > { %s3727_s10 = smov 256   ;;  %s3728_s11 = smov 128  }
  0x1d   : > { %s3729_s19 = smov 8   ;;  %s3828_s20 = sadd.s32 4294967295, %s3724_s17  }
  0x1e   : > { %3030 = dma.hbm_to_vmem [thread:$0]  (!%p3813_p7), %s177_s28, 36864, %s179_s4, %s3817_s5, %s3727_s10, %s3728_s11, %s3729_s19  }
  0x1f   : > { %s2680_s21 = sadd.s32 4294967294, %s3724_s17   ;;  %p75_p4 = scmp.ne.s32.totalorder %s3708_s13, %s3704_s12 }
  0x20   : > { %p4253_p5 = scmp.eq.s32.totalorder %s3828_s20, 0  ;;  %p125_p6 = scmp.eq.s32.totalorder %s3828_s20, 1 }
  0x21   : > { %p131_p9 = scmp.eq.s32.totalorder %s2680_s21, 1  ;;  %p2681_p11 = scmp.ge.s32.totalorder %s3724_s17, 1 }
  0x22   : > { %p3837_p10 = por %p4253_p5, %p75_p4  ;;  %p3845_p12 = por %p125_p6, %p69_p1 }
  0x23   : > { %p3849_p13 = por %p131_p9, %p75_p4  ;;  %p138_p0 = scmp.lt.s32.totalorder %s3724_s17, 3 }
  0x24   : > { %s4258_s25 = scalar_select %p3845_p12, 1, 0 }
  0x25   : > { %s4259_s26 = scalar_select %p3849_p13, 1, 0 }
  0x26   : > { %p3854_p2 = pnand %p2681_p11, %p138_p0  ;;  %s3730_s28 = smov [#allocation3]  }
  0x27   : > { %s150_s30 = sshll.u32 %s3730_s28, 4  ;;  %s2686_s4 = sshll.u32 %s166_s22, 1  ;;  %s151_s30 = int_to_ptr.vmem [resolvable:$true] %s150_s30 }
  0x28   : > { %p3023_p3 = pneg %p3854_p2  ;;  %s3007_s6 = sshll.u32 %s3720_s16, 5 }
  0x29   : > { %s3872_s10 = scalar_lea.hbm %s4251_s2, %s3007_s6  ;;  %s192_s11 = scalar_lea.vmem [#allocation8], %s2686_s4 }
  0x2a   : > { %p3865_p1 = pnand %p3023_p3, %p4253_p5  ;;  %s200_s19 = sshll.u32 %s192_s11, 4  ;;  %s201_s19 = int_to_ptr.vmem [resolvable:$true] %s200_s19 }
  0x2b   : > { %s3597_s21 = scalar_lea.vmem %s151_s30, 2304  ;;  %p3605_p0 = scmp.lt.s32.totalorder %s151_s30, %s151_s30 }
  0x2c   : > { %p3588_p4 = pneg %p3865_p1  ;;  %p3598_p6 = scmp.ne.s32.totalorder %s151_s30, %s3597_s21 }
  0x2d   : > { %p3606_p3 = scmp.lt.s32.totalorder %s3597_s21, %s3597_s21 }
  0x2e   : > { %p3600_p9 = pnand %p3598_p6, %p3588_p4 }
  0x2f   : > { %p3607_p5 = por %p3606_p3, %p3605_p0 }
  0x30   : > { %p3601_p11 = pneg %p3600_p9 }
  0x32   : > { %p3608_p8 = pnand %p3607_p5, %p3601_p11 }
  0x34   : > { %3611 = shalt.err (!%p3608_p8)
}
  0x35   : > { %s3731_s22 = smov 1152   ;;  %s3732_s28 = smov 72  }
  0x36   : > { %3026 = dma.hbm_to_vmem [thread:$0]  (!%p3865_p1), %s4249_s0, 2304, %s151_s30, [#allocation4], %s3731_s22, %s3731_s22, %s3732_s28  }
  0x37   : > { %s3625_s8 = scalar_lea.vmem %s201_s19, 32  ;;  %p4262_p12 = pneg %p3813_p7 }
  0x38   : > { %p3626_p13 = scmp.ne.s32.totalorder %s201_s19, %s3625_s8  ;;  %s3733_s9 = smov [#allocation8]  }
  0x39   : > { %s3630_s11 = sshll.u32 %s3733_s9, 4  ;;  %s3631_s11 = int_to_ptr.vmem [resolvable:$false] %s3630_s11 }
  0x3a   : > { %p3628_p4 = pnand %p3626_p13, %p4262_p12  ;;  %s3632_s21 = scalar_lea.vmem %s3631_s11, 64 }
  0x3b   : > { %p3633_p8 = scmp.lt.s32.totalorder %s201_s19, %s3631_s11  ;;  %p3634_p5 = scmp.lt.s32.totalorder %s3632_s21, %s3625_s8 }
  0x3c   : > { %p3629_p6 = pneg %p3628_p4 }
  0x3d   : > { %p3635_p9 = por %p3634_p5, %p3633_p8 }
  0x3f   : > { %p3636_p11 = pnand %p3635_p9, %p3629_p6 }
  0x41   : > { %3639 = shalt.err (!%p3636_p11)
}
  0x42   : > { %3033 = dma.hbm_to_vmem [thread:$0]  (!%p3813_p7), %s3872_s10, 32, %s201_s19, %s3817_s5  }
  0x43   : > { %209 = sbr.rel (%p3854_p2) target bundleno = 621 (0x26d), region = 32  ;;  %p4263_p12 = scmp.eq.s32.totalorder (!%p3854_p2), %s3828_s20, 0 }
  0x48   : > { %3691 = dma.done.wait (%p4263_p12), [#allocation4], 2304   ;;  %p4264_p13 = pmov %p4263_p12 }
  0x49   : > { %s215_s30 = sand.u32 1, %s3828_s20   ;;  %s3896_s7 = sand.u32 1, %s3708_s13  }
  0x4a   : > { %3693 = vsyncadd (%p4264_p13), [#allocation4], 4294964992  ;;  %s3012_s29 = smul.u32 2304, %s3896_s7  ;;  %s216_s22 = scalar_lea.sflag [#allocation7], %s215_s30 }
  0x4c   : > { %s3899_s28 = scalar_lea.vmem [#allocation6], %s3012_s29 }
  0x4d   : > { %3695 = dma.done.wait (%p3837_p10), %s216_s22, 36896  }
  0x4e   : > { %3697 = vsyncadd (%p3837_p10), %s216_s22, 4294930400  ;;  %v3099_v0 = vld [vmem:[%s3899_s28 + $0x74] ss:$8 sps:$4 sm:$0xff]   ;;  %v3103_v2 = vld [vmem:[%s3899_s28 + $0x70] ss:$8 sps:$4 sm:$0xff]   ;;  %s2691_s5 = sshll.u32 %s3896_s7, 1 }
  0x4f   : > { %v3101_v1 = vld [vmem:[%s3899_s28 + $0x174] ss:$8 sps:$4 sm:$0xff]   ;;  %2111 = vmatprep.subr.bf16.mxu0 %v3099_v0  ;;  %v3104_v3 = vld [vmem:[%s3899_s28 + $0x170] ss:$8 sps:$4 sm:$0xff]   ;;  %v3105_v4 = vld [vmem:[%s3899_s28 + $0x64] ss:$8 sps:$4 sm:$0xff]  }
  0x50   : > { %2154 = vmatprep.subr.bf16.mxu1 %v3101_v1  ;;  %2112 = vmatpush1.bf16.msra.mxu0 %v3103_v2  ;;  %v3107_v5 = vld [vmem:[%s3899_s28 + $0x164] ss:$8 sps:$4 sm:$0xff]   ;;  %v3109_v6 = vld [vmem:[%s3899_s28 + $0x60] ss:$8 sps:$4 sm:$0xff]   ;;  %v3111_v8 = vld [vmem:[%s3899_s28 + $0x54] ss:$8 sps:$4 sm:$0xff]  }
  0x51   : > { %2155 = vmatpush1.bf16.msra.mxu1 %v3104_v3  ;;  %2113 = vmatprep.subr.bf16.mxu0 %v3105_v4  ;;  %v3110_v7 = vld [vmem:[%s3899_s28 + $0x160] ss:$8 sps:$4 sm:$0xff]   ;;  %v3113_v9 = vld [vmem:[%s3899_s28 + $0x154] ss:$8 sps:$4 sm:$0xff]   ;;  %v3115_v10 = vld [vmem:[%s3899_s28 + $0x50] ss:$8 sps:$4 sm:$0xff]  }
  0x52   : > { %2156 = vmatprep.subr.bf16.mxu1 %v3107_v5  ;;  %v3116_v11 = vld [vmem:[%s3899_s28 + $0x150] ss:$8 sps:$4 sm:$0xff]   ;;  %v3117_v12 = vld [vmem:[%s3899_s28 + $0x44] ss:$8 sps:$4 sm:$0xff]   ;;  %v3121_v14 = vld [vmem:[%s3899_s28 + $0x40] ss:$8 sps:$4 sm:$0xff]  }
  0x53   : > { %v3119_v13 = vld [vmem:[%s3899_s28 + $0x144] ss:$8 sps:$4 sm:$0xff]   ;;  %v3122_v15 = vld [vmem:[%s3899_s28 + $0x140] ss:$8 sps:$4 sm:$0xff]   ;;  %v3123_v16 = vld [vmem:[%s3899_s28 + $0x34] ss:$8 sps:$4 sm:$0xff]  }
  0x54   : > { %2114 = vmatpush1.bf16.msra.mxu0 %v3109_v6  ;;  %v3125_v17 = vld [vmem:[%s3899_s28 + $0x134] ss:$8 sps:$4 sm:$0xff]   ;;  %v3127_v18 = vld [vmem:[%s3899_s28 + $0x30] ss:$8 sps:$4 sm:$0xff]   ;;  %v3129_v20 = vld [vmem:[%s3899_s28 + $0x24] ss:$8 sps:$4 sm:$0xff]  }
  0x55   : > { %2157 = vmatpush1.bf16.msra.mxu1 %v3110_v7  ;;  %2115 = vmatprep.subr.bf16.mxu0 %v3111_v8  ;;  %v3128_v19 = vld [vmem:[%s3899_s28 + $0x130] ss:$8 sps:$4 sm:$0xff]   ;;  %v3131_v21 = vld [vmem:[%s3899_s28 + $0x124] ss:$8 sps:$4 sm:$0xff]   ;;  %v3133_v22 = vld [vmem:[%s3899_s28 + $0x20] ss:$8 sps:$4 sm:$0xff]  }
  0x56   : > { %2158 = vmatprep.subr.bf16.mxu1 %v3113_v9  ;;  %v3134_v23 = vld [vmem:[%s3899_s28 + $0x120] ss:$8 sps:$4 sm:$0xff]   ;;  %v3135_v24 = vld [vmem:[%s3899_s28 + $0x14] ss:$8 sps:$4 sm:$0xff]   ;;  %v3139_v26 = vld [vmem:[%s3899_s28 + $0x10] ss:$8 sps:$4 sm:$0xff]  }
  0x57   : > { %v3137_v25 = vld [vmem:[%s3899_s28 + $0x114] ss:$8 sps:$4 sm:$0xff]   ;;  %v3140_v27 = vld [vmem:[%s3899_s28 + $0x110] ss:$8 sps:$4 sm:$0xff]   ;;  %v3141_v28 = vld [vmem:[%s3899_s28 + $0x4] ss:$8 sps:$4 sm:$0xff]  }
  0x58   : > { %2116 = vmatpush1.bf16.msra.mxu0 %v3115_v10  ;;  %v3143_v29 = vld [vmem:[%s3899_s28 + $0x104] ss:$8 sps:$4 sm:$0xff]   ;;  %v3145_v30 = vld [vmem:[%s3899_s28] ss:$8 sps:$4 sm:$0xff]   ;;  %v3147_v32 = vld [vmem:[%s3899_s28 + $0xf4] ss:$8 sps:$4 sm:$0xff]  }
  0x59   : > { %2159 = vmatpush1.bf16.msra.mxu1 %v3116_v11  ;;  %2117 = vmatprep.subr.bf16.mxu0 %v3117_v12  ;;  %v3146_v31 = vld [vmem:[%s3899_s28 + $0x100] ss:$8 sps:$4 sm:$0xff]   ;;  %v3149_v33 = vld [vmem:[%s3899_s28 + $0x1f4] ss:$8 sps:$4 sm:$0xff]   ;;  %v3151_v34 = vld [vmem:[%s3899_s28 + $0xf0] ss:$8 sps:$4 sm:$0xff]  }
  0x5a   : > { %2160 = vmatprep.subr.bf16.mxu1 %v3119_v13  ;;  %v3152_v35 = vld [vmem:[%s3899_s28 + $0x1f0] ss:$8 sps:$4 sm:$0xff]   ;;  %v3153_v36 = vld [vmem:[%s3899_s28 + $0xe4] ss:$8 sps:$4 sm:$0xff]   ;;  %v3157_v38 = vld [vmem:[%s3899_s28 + $0xe0] ss:$8 sps:$4 sm:$0xff]  }
  0x5b   : > { %v3155_v37 = vld [vmem:[%s3899_s28 + $0x1e4] ss:$8 sps:$4 sm:$0xff]   ;;  %v3158_v39 = vld [vmem:[%s3899_s28 + $0x1e0] ss:$8 sps:$4 sm:$0xff]   ;;  %v3159_v40 = vld [vmem:[%s3899_s28 + $0xd4] ss:$8 sps:$4 sm:$0xff]  }
  0x5c   : > { %2118 = vmatpush1.bf16.msra.mxu0 %v3121_v14  ;;  %v3161_v41 = vld [vmem:[%s3899_s28 + $0x1d4] ss:$8 sps:$4 sm:$0xff]   ;;  %v3163_v42 = vld [vmem:[%s3899_s28 + $0xd0] ss:$8 sps:$4 sm:$0xff]   ;;  %v3165_v44 = vld [vmem:[%s3899_s28 + $0xc4] ss:$8 sps:$4 sm:$0xff]  }
  0x5d   : > { %2161 = vmatpush1.bf16.msra.mxu1 %v3122_v15  ;;  %2119 = vmatprep.subr.bf16.mxu0 %v3123_v16  ;;  %v3164_v43 = vld [vmem:[%s3899_s28 + $0x1d0] ss:$8 sps:$4 sm:$0xff]   ;;  %v3167_v45 = vld [vmem:[%s3899_s28 + $0x1c4] ss:$8 sps:$4 sm:$0xff]   ;;  %v3169_v46 = vld [vmem:[%s3899_s28 + $0xc0] ss:$8 sps:$4 sm:$0xff]  }
  0x5e   : > { %2162 = vmatprep.subr.bf16.mxu1 %v3125_v17  ;;  %v3170_v47 = vld [vmem:[%s3899_s28 + $0x1c0] ss:$8 sps:$4 sm:$0xff]   ;;  %v3171_v48 = vld [vmem:[%s3899_s28 + $0xb4] ss:$8 sps:$4 sm:$0xff]   ;;  %v3175_v52 = vld [vmem:[%s3899_s28 + $0xb0] ss:$8 sps:$4 sm:$0xff]  }
  0x5f   : > { %v3197_v49 = vld [vmem:[#allocation3 + $0x4] ss:$72 sps:$4 sm:$0xff]   ;;  %v3176_v53 = vld [vmem:[%s3899_s28 + $0x1b0] ss:$8 sps:$4 sm:$0xff]   ;;  %v3177_v54 = vld [vmem:[%s3899_s28 + $0xa4] ss:$8 sps:$4 sm:$0xff]  }
  0x60   : > { %2120 = vmatpush1.bf16.msra.mxu0 %v3127_v18  ;;  %v3173_v50 = vld [vmem:[%s3899_s28 + $0x1b4] ss:$8 sps:$4 sm:$0xff]   ;;  %2143 = vmatprep.mubr.bf16.mxu0 %v3197_v49  ;;  %v3179_v55 = vld [vmem:[%s3899_s28 + $0x1a4] ss:$8 sps:$4 sm:$0xff]   ;;  %v3181_v56 = vld [vmem:[%s3899_s28 + $0xa0] ss:$8 sps:$4 sm:$0xff]  }
  0x61   : > { %2163 = vmatpush1.bf16.msra.mxu1 %v3128_v19  ;;  %2121 = vmatprep.subr.bf16.mxu0 %v3129_v20  ;;  %v3200_v51 = vld [vmem:[#allocation3 + $0xc] ss:$72 sps:$4 sm:$0xff]   ;;  %v3182_v57 = vld [vmem:[%s3899_s28 + $0x1a0] ss:$8 sps:$4 sm:$0xff]   ;;  %v3187_v60 = vld [vmem:[%s3899_s28 + $0x90] ss:$8 sps:$4 sm:$0xff]  }
  0x62   : > { %2164 = vmatprep.subr.bf16.mxu1 %v3131_v21  ;;  %2186 = vmatprep.mubr.bf16.mxu1 %v3200_v51  ;;  %v3183_v58 = vld [vmem:[%s3899_s28 + $0x94] ss:$8 sps:$4 sm:$0xff]   ;;  %v3188_v61 = vld [vmem:[%s3899_s28 + $0x190] ss:$8 sps:$4 sm:$0xff]   ;;  %v3189_v62 = vld [vmem:[%s3899_s28 + $0x84] ss:$8 sps:$4 sm:$0xff]  }
  0x63   : > { %v3185_v59 = vld [vmem:[%s3899_s28 + $0x194] ss:$8 sps:$4 sm:$0xff]   ;;  %v3191_v63 = vld [vmem:[%s3899_s28 + $0x184] ss:$8 sps:$4 sm:$0xff]   ;;  %v3193_v0 = vld [vmem:[%s3899_s28 + $0x80] ss:$8 sps:$4 sm:$0xff]  }
  0x64   : > { %2122 = vmatpush1.bf16.msra.mxu0 %v3133_v22  ;;  %v3194_v1 = vld [vmem:[%s3899_s28 + $0x180] ss:$8 sps:$4 sm:$0xff]   ;;  %v3203_v2 = vld [vmem:[%s3899_s28 + $0x274] ss:$8 sps:$4 sm:$0xff]   ;;  %v3195_v4 = vld [vmem:[#allocation3] ss:$72 sps:$4 sm:$0xff]  }
  0x65   : > { %2165 = vmatpush1.bf16.msra.mxu1 %v3134_v23  ;;  %2123 = vmatprep.subr.bf16.mxu0 %v3135_v24  ;;  %v3206_v3 = vld [vmem:[%s3899_s28 + $0x374] ss:$8 sps:$4 sm:$0xff]   ;;  %v3198_v5 = vld [vmem:[#allocation3 + $0x8] ss:$72 sps:$4 sm:$0xff]   ;;  %v3209_v8 = vld [vmem:[%s3899_s28 + $0x264] ss:$8 sps:$4 sm:$0xff]  }
  0x66   : > { %2166 = vmatprep.subr.bf16.mxu1 %v3137_v25  ;;  %v3201_v6 = vld [vmem:[%s3899_s28 + $0x270] ss:$8 sps:$4 sm:$0xff]   ;;  %v3212_v9 = vld [vmem:[%s3899_s28 + $0x364] ss:$8 sps:$4 sm:$0xff]   ;;  %v3207_v10 = vld [vmem:[%s3899_s28 + $0x260] ss:$8 sps:$4 sm:$0xff]  }
  0x67   : > { %v3204_v7 = vld [vmem:[%s3899_s28 + $0x370] ss:$8 sps:$4 sm:$0xff]   ;;  %v3210_v11 = vld [vmem:[%s3899_s28 + $0x360] ss:$8 sps:$4 sm:$0xff]   ;;  %v3215_v12 = vld [vmem:[%s3899_s28 + $0x254] ss:$8 sps:$4 sm:$0xff]  }
  0x68   : > { %2124 = vmatpush1.bf16.msra.mxu0 %v3139_v26  ;;  %v3218_v13 = vld [vmem:[%s3899_s28 + $0x354] ss:$8 sps:$4 sm:$0xff]   ;;  %v3213_v14 = vld [vmem:[%s3899_s28 + $0x250] ss:$8 sps:$4 sm:$0xff]   ;;  %v3221_v16 = vld [vmem:[%s3899_s28 + $0x244] ss:$8 sps:$4 sm:$0xff]  }
  0x69   : > { %2167 = vmatpush1.bf16.msra.mxu1 %v3140_v27  ;;  %2125 = vmatprep.subr.bf16.mxu0 %v3141_v28  ;;  %v3216_v15 = vld [vmem:[%s3899_s28 + $0x350] ss:$8 sps:$4 sm:$0xff]   ;;  %v3224_v17 = vld [vmem:[%s3899_s28 + $0x344] ss:$8 sps:$4 sm:$0xff]   ;;  %v3219_v18 = vld [vmem:[%s3899_s28 + $0x240] ss:$8 sps:$4 sm:$0xff]  }
  0x6a   : > { %2168 = vmatprep.subr.bf16.mxu1 %v3143_v29  ;;  %v3222_v19 = vld [vmem:[%s3899_s28 + $0x340] ss:$8 sps:$4 sm:$0xff]   ;;  %v3227_v20 = vld [vmem:[%s3899_s28 + $0x234] ss:$8 sps:$4 sm:$0xff]   ;;  %v3225_v22 = vld [vmem:[%s3899_s28 + $0x230] ss:$8 sps:$4 sm:$0xff]  }
  0x6b   : > { %v3230_v21 = vld [vmem:[%s3899_s28 + $0x334] ss:$8 sps:$4 sm:$0xff]   ;;  %v3228_v23 = vld [vmem:[%s3899_s28 + $0x330] ss:$8 sps:$4 sm:$0xff]   ;;  %v3233_v24 = vld [vmem:[%s3899_s28 + $0x224] ss:$8 sps:$4 sm:$0xff]  }
  0x6c   : > { %2126 = vmatpush1.bf16.msra.mxu0 %v3145_v30  ;;  %v3236_v25 = vld [vmem:[%s3899_s28 + $0x324] ss:$8 sps:$4 sm:$0xff]   ;;  %v3231_v26 = vld [vmem:[%s3899_s28 + $0x220] ss:$8 sps:$4 sm:$0xff]   ;;  %v3239_v28 = vld [vmem:[%s3899_s28 + $0x214] ss:$8 sps:$4 sm:$0xff]  }
  0x6d   : > { %2169 = vmatpush1.bf16.msra.mxu1 %v3146_v31  ;;  %2127 = vmatprep.subr.bf16.mxu0 %v3147_v32  ;;  %v3234_v27 = vld [vmem:[%s3899_s28 + $0x320] ss:$8 sps:$4 sm:$0xff]   ;;  %v3242_v29 = vld [vmem:[%s3899_s28 + $0x314] ss:$8 sps:$4 sm:$0xff]   ;;  %v3237_v30 = vld [vmem:[%s3899_s28 + $0x210] ss:$8 sps:$4 sm:$0xff]  }
  0x6e   : > { %2170 = vmatprep.subr.bf16.mxu1 %v3149_v33  ;;  %v3240_v31 = vld [vmem:[%s3899_s28 + $0x310] ss:$8 sps:$4 sm:$0xff]   ;;  %v3245_v32 = vld [vmem:[%s3899_s28 + $0x204] ss:$8 sps:$4 sm:$0xff]   ;;  %s228_s20 = scalar_lea.vmem [#allocation8], %s2691_s5  ;;  %s2692_s23 = sshll.u32 %s3896_s7, 4 }
  0x6f   : > { %v3248_v33 = vld [vmem:[%s3899_s28 + $0x304] ss:$8 sps:$4 sm:$0xff]   ;;  %v3264_v49 = vld [vmem:[%s3899_s28 + $0x3d0] ss:$8 sps:$4 sm:$0xff]   ;;  %s255_s27 = scalar_lea.vmem [#allocation9], %s2692_s23  ;;  %s3010_s19 = sshll.u32 %s3716_s15, 7 }
  0x70   : > { %2128 = vmatpush2.bf16.msra.mxu0 %v3151_v34  ;;  %v3299_v34 = vld [vmem:[#allocation3 + $0x14] ss:$72 sps:$4 sm:$0xff]   ;;  %s2561_s10 = sshll.u32 %s255_s27, 4  ;;  %s4201_s8 = scalar_lea.hbm %s4252_s3, %s3010_s19  ;;  %s4196_s10 = int_to_ptr.vmem [resolvable:$true] %s2561_s10 }
  0x71   : > { %2171 = vmatpush2.bf16.msra.mxu1 %v3152_v35  ;;  %2129 = vmatprep.subr.bf16.mxu0 %v3153_v36  ;;  %v3243_v35 = vld [vmem:[%s3899_s28 + $0x200] ss:$8 sps:$4 sm:$0xff]   ;;  %v3272_v51 = vld [vmem:[%s3899_s28 + $0x3c4] ss:$8 sps:$4 sm:$0xff]   ;;  %s2548_s9 = scalar_lea.sflag [#allocation5], %s3896_s7  ;;  %s3640_s11 = scalar_lea.vmem %s4196_s10, 256 }
  0x72   : > { %2172 = vmatprep.subr.bf16.mxu1 %v3155_v37  ;;  %v3246_v36 = vld [vmem:[%s3899_s28 + $0x300] ss:$8 sps:$4 sm:$0xff]   ;;  %v3305_v37 = vld [vmem:[#allocation3 + $0x1c] ss:$72 sps:$4 sm:$0xff]   ;;  %p3641_p7 = scmp.ne.s32.totalorder %s4196_s10, %s3640_s11  ;;  %p4265_p10 = scmp.ne.s32.totalorder %s4258_s25, 0 }
  0x73   : > { %s3734_s15 = smov [#allocation9]  }
  0x74   : > { %2130 = vmatpush2.bf16.msra.mxu0 %v3157_v38  ;;  %v3251_v38 = vld [vmem:[%s3899_s28 + $0x2f4] ss:$8 sps:$4 sm:$0xff]   ;;  %p3642_p2 = pnand %p3641_p7, %p4265_p10  ;;  %s3644_s21 = sshll.u32 %s3734_s15, 4  ;;  %s3645_s21 = int_to_ptr.vmem [resolvable:$false] %s3644_s21 }
  0x75   : > { %2173 = vmatpush2.bf16.msra.mxu1 %v3158_v39  ;;  %2131 = vmatprep.subr.bf16.mxu0 %v3159_v40  ;;  %v3254_v39 = vld [vmem:[%s3899_s28 + $0x3f4] ss:$8 sps:$4 sm:$0xff]   ;;  %v3249_v40 = vld [vmem:[%s3899_s28 + $0x2f0] ss:$8 sps:$4 sm:$0xff]   ;;  %s3646_s30 = scalar_lea.vmem %s3645_s21, 512  ;;  %p3647_p0 = scmp.lt.s32.totalorder %s4196_s10, %s3645_s21 }
  0x76   : > { %2174 = vmatprep.subr.bf16.mxu1 %v3161_v41  ;;  %v3252_v41 = vld [vmem:[%s3899_s28 + $0x3f0] ss:$8 sps:$4 sm:$0xff]   ;;  %p3643_p1 = pneg %p3642_p2  ;;  %p3648_p3 = scmp.lt.s32.totalorder %s3646_s30, %s3640_s11 }
  0x78   : > { %2132 = vmatpush2.bf16.msra.mxu0 %v3163_v42  ;;  %v3257_v42 = vld [vmem:[%s3899_s28 + $0x2e4] ss:$8 sps:$4 sm:$0xff]   ;;  %p3649_p4 = por %p3648_p3, %p3647_p0 }
  0x79   : > { %2175 = vmatpush2.bf16.msra.mxu1 %v3164_v43  ;;  %2133 = vmatprep.subr.bf16.mxu0 %v3165_v44  ;;  %v3260_v43 = vld [vmem:[%s3899_s28 + $0x3e4] ss:$8 sps:$4 sm:$0xff]   ;;  %v3255_v44 = vld [vmem:[%s3899_s28 + $0x2e0] ss:$8 sps:$4 sm:$0xff]  }
  0x7a   : > { %2176 = vmatprep.subr.bf16.mxu1 %v3167_v45  ;;  %v3258_v45 = vld [vmem:[%s3899_s28 + $0x3e0] ss:$8 sps:$4 sm:$0xff]   ;;  %p3650_p6 = pnand %p3649_p4, %p3643_p1 }
  0x7c   : > { %2134 = vmatpush2.bf16.msra.mxu0 %v3169_v46  ;;  %v3263_v46 = vld [vmem:[%s3899_s28 + $0x2d4] ss:$8 sps:$4 sm:$0xff]  }
  0x7d   : > { %2177 = vmatpush2.bf16.msra.mxu1 %v3170_v47  ;;  %2135 = vmatprep.subr.bf16.mxu0 %v3171_v48  ;;  %v3266_v47 = vld [vmem:[%s3899_s28 + $0x3d4] ss:$8 sps:$4 sm:$0xff]   ;;  %v3261_v48 = vld [vmem:[%s3899_s28 + $0x2d0] ss:$8 sps:$4 sm:$0xff]  }
  0x7e   : > { %2178 = vmatprep.subr.bf16.mxu1 %v3173_v50  ;;  %v3269_v50 = vld [vmem:[%s3899_s28 + $0x2c4] ss:$8 sps:$4 sm:$0xff]  }
  0x80   : > { %2136 = vmatpush2.bf16.msra.mxu0 %v3175_v52  ;;  %v3267_v52 = vld [vmem:[%s3899_s28 + $0x2c0] ss:$8 sps:$4 sm:$0xff]  }
  0x81   : > { %2179 = vmatpush2.bf16.msra.mxu1 %v3176_v53  ;;  %2137 = vmatprep.subr.bf16.mxu0 %v3177_v54  ;;  %v3270_v53 = vld [vmem:[%s3899_s28 + $0x3c0] ss:$8 sps:$4 sm:$0xff]   ;;  %v3275_v54 = vld [vmem:[%s3899_s28 + $0x2b4] ss:$8 sps:$4 sm:$0xff]  }
  0x82   : > { %2180 = vmatprep.subr.bf16.mxu1 %v3179_v55  ;;  %v3278_v55 = vld [vmem:[%s3899_s28 + $0x3b4] ss:$8 sps:$4 sm:$0xff]  }
  0x84   : > { %2138 = vmatpush2.bf16.msra.mxu0 %v3181_v56  ;;  %v3273_v56 = vld [vmem:[%s3899_s28 + $0x2b0] ss:$8 sps:$4 sm:$0xff]  }
  0x85   : > { %2181 = vmatpush2.bf16.msra.mxu1 %v3182_v57  ;;  %2139 = vmatprep.subr.bf16.mxu0 %v3183_v58  ;;  %v3276_v57 = vld [vmem:[%s3899_s28 + $0x3b0] ss:$8 sps:$4 sm:$0xff]   ;;  %v3281_v58 = vld [vmem:[%s3899_s28 + $0x2a4] ss:$8 sps:$4 sm:$0xff]  }
  0x86   : > { %2182 = vmatprep.subr.bf16.mxu1 %v3185_v59  ;;  %v3284_v59 = vld [vmem:[%s3899_s28 + $0x3a4] ss:$8 sps:$4 sm:$0xff]  }
  0x88   : > { %2140 = vmatpush2.bf16.msra.mxu0 %v3187_v60  ;;  %v3279_v60 = vld [vmem:[%s3899_s28 + $0x2a0] ss:$8 sps:$4 sm:$0xff]  }
  0x89   : > { %2183 = vmatpush2.bf16.msra.mxu1 %v3188_v61  ;;  %2141 = vmatprep.subr.bf16.mxu0 %v3189_v62  ;;  %v3282_v61 = vld [vmem:[%s3899_s28 + $0x3a0] ss:$8 sps:$4 sm:$0xff]   ;;  %v3287_v62 = vld [vmem:[%s3899_s28 + $0x294] ss:$8 sps:$4 sm:$0xff]  }
  0x8a   : > { %2184 = vmatprep.subr.bf16.mxu1 %v3191_v63  ;;  %v3290_v63 = vld [vmem:[%s3899_s28 + $0x394] ss:$8 sps:$4 sm:$0xff]  }
  0x8c   : > { %2142 = vmatpush2.bf16.msra.mxu0 %v3193_v0  ;;  %v3285_v0 = vld [vmem:[%s3899_s28 + $0x290] ss:$8 sps:$4 sm:$0xff]  }
  0x8d   : > { %2185 = vmatpush2.bf16.msra.mxu1 %v3194_v1  ;;  %2197 = vmatprep.subr.bf16.mxu0 %v3203_v2  ;;  %v3288_v1 = vld [vmem:[%s3899_s28 + $0x390] ss:$8 sps:$4 sm:$0xff]   ;;  %v3293_v2 = vld [vmem:[%s3899_s28 + $0x284] ss:$8 sps:$4 sm:$0xff]  }
  0x8e   : > { %2240 = vmatprep.subr.bf16.mxu1 %v3206_v3  ;;  %v3296_v3 = vld [vmem:[%s3899_s28 + $0x384] ss:$8 sps:$4 sm:$0xff]  }
  0x8f   : > { %2144 = vmatmul.mubr.bf16.vlgmr.msra.gmra.mxu0 %v3195_v4  ;;  %v3291_v4 = vld [vmem:[%s3899_s28 + $0x280] ss:$8 sps:$4 sm:$0xff]  }
  0x90   : > { %2187 = vmatmul.mubr.bf16.vlgmr.msra.gmra.mxu1 %v3198_v5  ;;  %2198 = vmatpush1.bf16.msra.mxu0 %v3201_v6  ;;  %v3294_v5 = vld [vmem:[%s3899_s28 + $0x380] ss:$8 sps:$4 sm:$0xff]   ;;  %v3302_v6 = vld [vmem:[%s3899_s28 + $0x474] ss:$8 sps:$4 sm:$0xff]  }
  0x91   : > { %2241 = vmatpush1.bf16.msra.mxu1 %v3204_v7  ;;  %2199 = vmatprep.subr.bf16.mxu0 %v3209_v8  ;;  %v3308_v7 = vld [vmem:[%s3899_s28 + $0x574] ss:$8 sps:$4 sm:$0xff]   ;;  %v3297_v8 = vld [vmem:[#allocation3 + $0x10] ss:$72 sps:$4 sm:$0xff]  }
  0x92   : > { %2242 = vmatprep.subr.bf16.mxu1 %v3212_v9  ;;  %2229 = vmatprep.mubr.bf16.mxu0 %v3299_v34  ;;  %v3300_v9 = vld [vmem:[%s3899_s28 + $0x470] ss:$8 sps:$4 sm:$0xff]   ;;  %v3341_v34 = vld [vmem:[%s3899_s28 + $0x414] ss:$8 sps:$4 sm:$0xff]  }
  0x93   : > { %2272 = vmatprep.mubr.bf16.mxu1 %v3305_v37  ;;  %v3342_v37 = vld [vmem:[%s3899_s28 + $0x510] ss:$8 sps:$4 sm:$0xff]  }
  0x94   : > { %2200 = vmatpush1.bf16.msra.mxu0 %v3207_v10  ;;  %v3303_v10 = vld [vmem:[#allocation3 + $0x18] ss:$72 sps:$4 sm:$0xff]  }
  0x95   : > { %2243 = vmatpush1.bf16.msra.mxu1 %v3210_v11  ;;  %2201 = vmatprep.subr.bf16.mxu0 %v3215_v12  ;;  %v3306_v11 = vld [vmem:[%s3899_s28 + $0x570] ss:$8 sps:$4 sm:$0xff]   ;;  %v3311_v12 = vld [vmem:[%s3899_s28 + $0x464] ss:$8 sps:$4 sm:$0xff]  }
  0x96   : > { %2244 = vmatprep.subr.bf16.mxu1 %v3218_v13  ;;  %v3314_v13 = vld [vmem:[%s3899_s28 + $0x564] ss:$8 sps:$4 sm:$0xff]  }
  0x98   : > { %2202 = vmatpush1.bf16.msra.mxu0 %v3213_v14  ;;  %v3309_v14 = vld [vmem:[%s3899_s28 + $0x460] ss:$8 sps:$4 sm:$0xff]  }
  0x99   : > { %2245 = vmatpush1.bf16.msra.mxu1 %v3216_v15  ;;  %2203 = vmatprep.subr.bf16.mxu0 %v3221_v16  ;;  %v3312_v15 = vld [vmem:[%s3899_s28 + $0x560] ss:$8 sps:$4 sm:$0xff]   ;;  %v3317_v16 = vld [vmem:[%s3899_s28 + $0x454] ss:$8 sps:$4 sm:$0xff]  }
  0x9a   : > { %2246 = vmatprep.subr.bf16.mxu1 %v3224_v17  ;;  %v3320_v17 = vld [vmem:[%s3899_s28 + $0x554] ss:$8 sps:$4 sm:$0xff]  }
  0x9c   : > { %2204 = vmatpush1.bf16.msra.mxu0 %v3219_v18  ;;  %v3315_v18 = vld [vmem:[%s3899_s28 + $0x450] ss:$8 sps:$4 sm:$0xff]  }
  0x9d   : > { %2247 = vmatpush1.bf16.msra.mxu1 %v3222_v19  ;;  %2205 = vmatprep.subr.bf16.mxu0 %v3227_v20  ;;  %v3401_v19 = vld [vmem:[#allocation3 + $0x24] ss:$72 sps:$4 sm:$0xff]   ;;  %v3318_v20 = vld [vmem:[%s3899_s28 + $0x550] ss:$8 sps:$4 sm:$0xff]  }
  0x9e   : > { %2248 = vmatprep.subr.bf16.mxu1 %v3230_v21  ;;  %v3323_v21 = vld [vmem:[%s3899_s28 + $0x444] ss:$8 sps:$4 sm:$0xff]  }
  0xa0   : > { %2206 = vmatpush1.bf16.msra.mxu0 %v3225_v22  ;;  %v3326_v22 = vld [vmem:[%s3899_s28 + $0x544] ss:$8 sps:$4 sm:$0xff]  }
  0xa1   : > { %2249 = vmatpush1.bf16.msra.mxu1 %v3228_v23  ;;  %2207 = vmatprep.subr.bf16.mxu0 %v3233_v24  ;;  %v3407_v23 = vld [vmem:[#allocation3 + $0x2c] ss:$72 sps:$4 sm:$0xff]   ;;  %v3321_v24 = vld [vmem:[%s3899_s28 + $0x440] ss:$8 sps:$4 sm:$0xff]  }
  0xa2   : > { %2250 = vmatprep.subr.bf16.mxu1 %v3236_v25  ;;  %v3324_v25 = vld [vmem:[%s3899_s28 + $0x540] ss:$8 sps:$4 sm:$0xff]  }
  0xa4   : > { %2208 = vmatpush1.bf16.msra.mxu0 %v3231_v26  ;;  %v3329_v26 = vld [vmem:[%s3899_s28 + $0x434] ss:$8 sps:$4 sm:$0xff]  }
  0xa5   : > { %2251 = vmatpush1.bf16.msra.mxu1 %v3234_v27  ;;  %2209 = vmatprep.subr.bf16.mxu0 %v3239_v28  ;;  %v3332_v27 = vld [vmem:[%s3899_s28 + $0x534] ss:$8 sps:$4 sm:$0xff]   ;;  %v3327_v28 = vld [vmem:[%s3899_s28 + $0x430] ss:$8 sps:$4 sm:$0xff]  }
  0xa6   : > { %2252 = vmatprep.subr.bf16.mxu1 %v3242_v29  ;;  %v3330_v29 = vld [vmem:[%s3899_s28 + $0x530] ss:$8 sps:$4 sm:$0xff]  }
  0xa8   : > { %2210 = vmatpush1.bf16.msra.mxu0 %v3237_v30  ;;  %v3335_v30 = vld [vmem:[%s3899_s28 + $0x424] ss:$8 sps:$4 sm:$0xff]  }
  0xa9   : > { %2253 = vmatpush1.bf16.msra.mxu1 %v3240_v31  ;;  %2211 = vmatprep.subr.bf16.mxu0 %v3245_v32  ;;  %v3338_v31 = vld [vmem:[%s3899_s28 + $0x524] ss:$8 sps:$4 sm:$0xff]   ;;  %v3333_v32 = vld [vmem:[%s3899_s28 + $0x420] ss:$8 sps:$4 sm:$0xff]  }
  0xaa   : > { %2254 = vmatprep.subr.bf16.mxu1 %v3248_v33  ;;  %v3336_v33 = vld [vmem:[%s3899_s28 + $0x520] ss:$8 sps:$4 sm:$0xff]  }
  0xac   : > { %2212 = vmatpush1.bf16.msra.mxu0 %v3243_v35  ;;  %v3344_v35 = vld [vmem:[%s3899_s28 + $0x514] ss:$8 sps:$4 sm:$0xff]  }
  0xad   : > { %2255 = vmatpush1.bf16.msra.mxu1 %v3246_v36  ;;  %2213 = vmatprep.subr.bf16.mxu0 %v3251_v38  ;;  %v3339_v36 = vld [vmem:[%s3899_s28 + $0x410] ss:$8 sps:$4 sm:$0xff]   ;;  %v3347_v38 = vld [vmem:[%s3899_s28 + $0x404] ss:$8 sps:$4 sm:$0xff]  }
  0xae   : > { %2256 = vmatprep.subr.bf16.mxu1 %v3254_v39  ;;  %v3350_v39 = vld [vmem:[%s3899_s28 + $0x504] ss:$8 sps:$4 sm:$0xff]  }
  0xb0   : > { %2214 = vmatpush2.bf16.msra.mxu0 %v3249_v40  ;;  %v3345_v40 = vld [vmem:[%s3899_s28 + $0x400] ss:$8 sps:$4 sm:$0xff]  }
  0xb1   : > { %2257 = vmatpush2.bf16.msra.mxu1 %v3252_v41  ;;  %2215 = vmatprep.subr.bf16.mxu0 %v3257_v42  ;;  %v3348_v41 = vld [vmem:[%s3899_s28 + $0x500] ss:$8 sps:$4 sm:$0xff]   ;;  %v3353_v42 = vld [vmem:[%s3899_s28 + $0x4f4] ss:$8 sps:$4 sm:$0xff]  }
  0xb2   : > { %2258 = vmatprep.subr.bf16.mxu1 %v3260_v43  ;;  %v3356_v43 = vld [vmem:[%s3899_s28 + $0x5f4] ss:$8 sps:$4 sm:$0xff]  }
  0xb4   : > { %2216 = vmatpush2.bf16.msra.mxu0 %v3255_v44  ;;  %v3351_v44 = vld [vmem:[%s3899_s28 + $0x4f0] ss:$8 sps:$4 sm:$0xff]  }
  0xb5   : > { %2259 = vmatpush2.bf16.msra.mxu1 %v3258_v45  ;;  %2217 = vmatprep.subr.bf16.mxu0 %v3263_v46  ;;  %v3354_v45 = vld [vmem:[%s3899_s28 + $0x5f0] ss:$8 sps:$4 sm:$0xff]   ;;  %v3359_v46 = vld [vmem:[%s3899_s28 + $0x4e4] ss:$8 sps:$4 sm:$0xff]  }
  0xb6   : > { %2260 = vmatprep.subr.bf16.mxu1 %v3266_v47  ;;  %v3362_v47 = vld [vmem:[%s3899_s28 + $0x5e4] ss:$8 sps:$4 sm:$0xff]  }
  0xb8   : > { %2218 = vmatpush2.bf16.msra.mxu0 %v3261_v48  ;;  %v3357_v48 = vld [vmem:[%s3899_s28 + $0x4e0] ss:$8 sps:$4 sm:$0xff]  }
  0xb9   : > { %2261 = vmatpush2.bf16.msra.mxu1 %v3264_v49  ;;  %2219 = vmatprep.subr.bf16.mxu0 %v3269_v50  ;;  %v3360_v49 = vld [vmem:[%s3899_s28 + $0x5e0] ss:$8 sps:$4 sm:$0xff]   ;;  %v3365_v50 = vld [vmem:[%s3899_s28 + $0x4d4] ss:$8 sps:$4 sm:$0xff]  }
  0xba   : > { %2262 = vmatprep.subr.bf16.mxu1 %v3272_v51  ;;  %v3368_v51 = vld [vmem:[%s3899_s28 + $0x5d4] ss:$8 sps:$4 sm:$0xff]  }
  0xbc   : > { %2220 = vmatpush2.bf16.msra.mxu0 %v3267_v52  ;;  %v3363_v52 = vld [vmem:[%s3899_s28 + $0x4d0] ss:$8 sps:$4 sm:$0xff]  }
  0xbd   : > { %2263 = vmatpush2.bf16.msra.mxu1 %v3270_v53  ;;  %2221 = vmatprep.subr.bf16.mxu0 %v3275_v54  ;;  %v3366_v53 = vld [vmem:[%s3899_s28 + $0x5d0] ss:$8 sps:$4 sm:$0xff]   ;;  %v3371_v54 = vld [vmem:[%s3899_s28 + $0x4c4] ss:$8 sps:$4 sm:$0xff]  }
  0xbe   : > { %2264 = vmatprep.subr.bf16.mxu1 %v3278_v55  ;;  %v3374_v55 = vld [vmem:[%s3899_s28 + $0x5c4] ss:$8 sps:$4 sm:$0xff]  }
  0xc0   : > { %2222 = vmatpush2.bf16.msra.mxu0 %v3273_v56  ;;  %v3369_v56 = vld [vmem:[%s3899_s28 + $0x4c0] ss:$8 sps:$4 sm:$0xff]  }
  0xc1   : > { %2265 = vmatpush2.bf16.msra.mxu1 %v3276_v57  ;;  %2223 = vmatprep.subr.bf16.mxu0 %v3281_v58  ;;  %v3372_v57 = vld [vmem:[%s3899_s28 + $0x5c0] ss:$8 sps:$4 sm:$0xff]   ;;  %v3377_v58 = vld [vmem:[%s3899_s28 + $0x4b4] ss:$8 sps:$4 sm:$0xff]  }
  0xc2   : > { %2266 = vmatprep.subr.bf16.mxu1 %v3284_v59  ;;  %v3380_v59 = vld [vmem:[%s3899_s28 + $0x5b4] ss:$8 sps:$4 sm:$0xff]  }
  0xc4   : > { %2224 = vmatpush2.bf16.msra.mxu0 %v3279_v60  ;;  %v3375_v60 = vld [vmem:[%s3899_s28 + $0x4b0] ss:$8 sps:$4 sm:$0xff]  }
  0xc5   : > { %2267 = vmatpush2.bf16.msra.mxu1 %v3282_v61  ;;  %2225 = vmatprep.subr.bf16.mxu0 %v3287_v62  ;;  %v3378_v61 = vld [vmem:[%s3899_s28 + $0x5b0] ss:$8 sps:$4 sm:$0xff]   ;;  %v3383_v62 = vld [vmem:[%s3899_s28 + $0x4a4] ss:$8 sps:$4 sm:$0xff]  }
  0xc6   : > { %2268 = vmatprep.subr.bf16.mxu1 %v3290_v63  ;;  %v3386_v63 = vld [vmem:[%s3899_s28 + $0x5a4] ss:$8 sps:$4 sm:$0xff]  }
  0xc8   : > { %2226 = vmatpush2.bf16.msra.mxu0 %v3285_v0  ;;  %v3381_v0 = vld [vmem:[%s3899_s28 + $0x4a0] ss:$8 sps:$4 sm:$0xff]  }
  0xc9   : > { %2269 = vmatpush2.bf16.msra.mxu1 %v3288_v1  ;;  %2227 = vmatprep.subr.bf16.mxu0 %v3293_v2  ;;  %v3384_v1 = vld [vmem:[%s3899_s28 + $0x5a0] ss:$8 sps:$4 sm:$0xff]   ;;  %v3389_v2 = vld [vmem:[%s3899_s28 + $0x494] ss:$8 sps:$4 sm:$0xff]  }
  0xca   : > { %2270 = vmatprep.subr.bf16.mxu1 %v3296_v3  ;;  %v3392_v3 = vld [vmem:[%s3899_s28 + $0x594] ss:$8 sps:$4 sm:$0xff]  }
  0xcc   : > { %2228 = vmatpush2.bf16.msra.mxu0 %v3291_v4  ;;  %v3387_v4 = vld [vmem:[%s3899_s28 + $0x490] ss:$8 sps:$4 sm:$0xff]  }
  0xcd   : > { %2271 = vmatpush2.bf16.msra.mxu1 %v3294_v5  ;;  %2283 = vmatprep.subr.bf16.mxu0 %v3302_v6  ;;  %v3390_v5 = vld [vmem:[%s3899_s28 + $0x590] ss:$8 sps:$4 sm:$0xff]   ;;  %v3395_v6 = vld [vmem:[%s3899_s28 + $0x484] ss:$8 sps:$4 sm:$0xff]  }
  0xce   : > { %2326 = vmatprep.subr.bf16.mxu1 %v3308_v7  ;;  %v3398_v7 = vld [vmem:[%s3899_s28 + $0x584] ss:$8 sps:$4 sm:$0xff]  }
  0xcf   : > { %2230 = vmatmul.mubr.bf16.vlgmr.msra.gmra.mxu0 %v3297_v8  ;;  %v3393_v8 = vld [vmem:[%s3899_s28 + $0x480] ss:$8 sps:$4 sm:$0xff]  }
  0xd0   : > { %2273 = vmatmul.mubr.bf16.vlgmr.msra.gmra.mxu1 %v3303_v10  ;;  %2284 = vmatpush1.bf16.msra.mxu0 %v3300_v9  ;;  %v3396_v9 = vld [vmem:[%s3899_s28 + $0x580] ss:$8 sps:$4 sm:$0xff]   ;;  %v3404_v10 = vld [vmem:[%s3899_s28 + $0x674] ss:$8 sps:$4 sm:$0xff]  }
  0xd1   : > { %2327 = vmatpush1.bf16.msra.mxu1 %v3306_v11  ;;  %2285 = vmatprep.subr.bf16.mxu0 %v3311_v12  ;;  %v3410_v11 = vld [vmem:[%s3899_s28 + $0x774] ss:$8 sps:$4 sm:$0xff]   ;;  %v3399_v12 = vld [vmem:[#allocation3 + $0x20] ss:$72 sps:$4 sm:$0xff]  }
  0xd2   : > { %2328 = vmatprep.subr.bf16.mxu1 %v3314_v13  ;;  %2315 = vmatprep.mubr.bf16.mxu0 %v3401_v19  ;;  %v3402_v13 = vld [vmem:[%s3899_s28 + $0x670] ss:$8 sps:$4 sm:$0xff]   ;;  %v3509_v19 = vld [vmem:[#allocation3 + $0x3c] ss:$72 sps:$4 sm:$0xff]  }
  0xd3   : > { %2358 = vmatprep.mubr.bf16.mxu1 %v3407_v23  ;;  %v3422_v23 = vld [vmem:[%s3899_s28 + $0x754] ss:$8 sps:$4 sm:$0xff]  }
  0xd4   : > { %2286 = vmatpush1.bf16.msra.mxu0 %v3309_v14  ;;  %v3405_v14 = vld [vmem:[#allocation3 + $0x28] ss:$72 sps:$4 sm:$0xff]  }
  0xd5   : > { %2329 = vmatpush1.bf16.msra.mxu1 %v3312_v15  ;;  %2287 = vmatprep.subr.bf16.mxu0 %v3317_v16  ;;  %v3408_v15 = vld [vmem:[%s3899_s28 + $0x770] ss:$8 sps:$4 sm:$0xff]   ;;  %v3413_v16 = vld [vmem:[%s3899_s28 + $0x664] ss:$8 sps:$4 sm:$0xff]  }
  0xd6   : > { %2330 = vmatprep.subr.bf16.mxu1 %v3320_v17  ;;  %v3416_v17 = vld [vmem:[%s3899_s28 + $0x764] ss:$8 sps:$4 sm:$0xff]  }
  0xd8   : > { %2288 = vmatpush1.bf16.msra.mxu0 %v3315_v18  ;;  %v3503_v18 = vld [vmem:[#allocation3 + $0x34] ss:$72 sps:$4 sm:$0xff]  }
  0xd9   : > { %2331 = vmatpush1.bf16.msra.mxu1 %v3318_v20  ;;  %2289 = vmatprep.subr.bf16.mxu0 %v3323_v21  ;;  %v3411_v20 = vld [vmem:[%s3899_s28 + $0x660] ss:$8 sps:$4 sm:$0xff]  }
  0xda   : > { %2332 = vmatprep.subr.bf16.mxu1 %v3326_v22  ;;  %v3414_v21 = vld [vmem:[%s3899_s28 + $0x760] ss:$8 sps:$4 sm:$0xff]   ;;  %v3419_v22 = vld [vmem:[%s3899_s28 + $0x654] ss:$8 sps:$4 sm:$0xff]  }
  0xdc   : > { %2290 = vmatpush1.bf16.msra.mxu0 %v3321_v24  ;;  %v3417_v24 = vld [vmem:[%s3899_s28 + $0x650] ss:$8 sps:$4 sm:$0xff]  }
  0xdd   : > { %2333 = vmatpush1.bf16.msra.mxu1 %v3324_v25  ;;  %2291 = vmatprep.subr.bf16.mxu0 %v3329_v26  ;;  %v3420_v25 = vld [vmem:[%s3899_s28 + $0x750] ss:$8 sps:$4 sm:$0xff]   ;;  %v3425_v26 = vld [vmem:[%s3899_s28 + $0x644] ss:$8 sps:$4 sm:$0xff]  }
  0xde   : > { %2334 = vmatprep.subr.bf16.mxu1 %v3332_v27  ;;  %v3428_v27 = vld [vmem:[%s3899_s28 + $0x744] ss:$8 sps:$4 sm:$0xff]  }
  0xe0   : > { %2292 = vmatpush1.bf16.msra.mxu0 %v3327_v28  ;;  %v3423_v28 = vld [vmem:[%s3899_s28 + $0x640] ss:$8 sps:$4 sm:$0xff]  }
  0xe1   : > { %2335 = vmatpush1.bf16.msra.mxu1 %v3330_v29  ;;  %2293 = vmatprep.subr.bf16.mxu0 %v3335_v30  ;;  %v3426_v29 = vld [vmem:[%s3899_s28 + $0x740] ss:$8 sps:$4 sm:$0xff]   ;;  %v3431_v30 = vld [vmem:[%s3899_s28 + $0x634] ss:$8 sps:$4 sm:$0xff]  }
  0xe2   : > { %2336 = vmatprep.subr.bf16.mxu1 %v3338_v31  ;;  %v3434_v31 = vld [vmem:[%s3899_s28 + $0x734] ss:$8 sps:$4 sm:$0xff]  }
  0xe4   : > { %2294 = vmatpush1.bf16.msra.mxu0 %v3333_v32  ;;  %v3429_v32 = vld [vmem:[%s3899_s28 + $0x630] ss:$8 sps:$4 sm:$0xff]  }
  0xe5   : > { %2337 = vmatpush1.bf16.msra.mxu1 %v3336_v33  ;;  %2295 = vmatprep.subr.bf16.mxu0 %v3341_v34  ;;  %v3432_v33 = vld [vmem:[%s3899_s28 + $0x730] ss:$8 sps:$4 sm:$0xff]   ;;  %v3437_v34 = vld [vmem:[%s3899_s28 + $0x624] ss:$8 sps:$4 sm:$0xff]  }
  0xe6   : > { %2338 = vmatprep.subr.bf16.mxu1 %v3344_v35  ;;  %v3440_v35 = vld [vmem:[%s3899_s28 + $0x724] ss:$8 sps:$4 sm:$0xff]  }
  0xe8   : > { %2296 = vmatpush1.bf16.msra.mxu0 %v3339_v36  ;;  %v3435_v36 = vld [vmem:[%s3899_s28 + $0x620] ss:$8 sps:$4 sm:$0xff]  }
  0xe9   : > { %2339 = vmatpush1.bf16.msra.mxu1 %v3342_v37  ;;  %2297 = vmatprep.subr.bf16.mxu0 %v3347_v38  ;;  %v3438_v37 = vld [vmem:[%s3899_s28 + $0x720] ss:$8 sps:$4 sm:$0xff]   ;;  %v3443_v38 = vld [vmem:[%s3899_s28 + $0x614] ss:$8 sps:$4 sm:$0xff]  }
  0xea   : > { %2340 = vmatprep.subr.bf16.mxu1 %v3350_v39  ;;  %v3446_v39 = vld [vmem:[%s3899_s28 + $0x714] ss:$8 sps:$4 sm:$0xff]  }
  0xec   : > { %2298 = vmatpush1.bf16.msra.mxu0 %v3345_v40  ;;  %v3441_v40 = vld [vmem:[%s3899_s28 + $0x610] ss:$8 sps:$4 sm:$0xff]  }
  0xed   : > { %2341 = vmatpush1.bf16.msra.mxu1 %v3348_v41  ;;  %2299 = vmatprep.subr.bf16.mxu0 %v3353_v42  ;;  %v3444_v41 = vld [vmem:[%s3899_s28 + $0x710] ss:$8 sps:$4 sm:$0xff]   ;;  %v3449_v42 = vld [vmem:[%s3899_s28 + $0x604] ss:$8 sps:$4 sm:$0xff]  }
  0xee   : > { %2342 = vmatprep.subr.bf16.mxu1 %v3356_v43  ;;  %v3452_v43 = vld [vmem:[%s3899_s28 + $0x704] ss:$8 sps:$4 sm:$0xff]  }
  0xf0   : > { %2300 = vmatpush2.bf16.msra.mxu0 %v3351_v44  ;;  %v3447_v44 = vld [vmem:[%s3899_s28 + $0x600] ss:$8 sps:$4 sm:$0xff]  }
  0xf1   : > { %2343 = vmatpush2.bf16.msra.mxu1 %v3354_v45  ;;  %2301 = vmatprep.subr.bf16.mxu0 %v3359_v46  ;;  %v3450_v45 = vld [vmem:[%s3899_s28 + $0x700] ss:$8 sps:$4 sm:$0xff]   ;;  %v3455_v46 = vld [vmem:[%s3899_s28 + $0x6f4] ss:$8 sps:$4 sm:$0xff]  }
  0xf2   : > { %2344 = vmatprep.subr.bf16.mxu1 %v3362_v47  ;;  %v3458_v47 = vld [vmem:[%s3899_s28 + $0x7f4] ss:$8 sps:$4 sm:$0xff]  }
  0xf4   : > { %2302 = vmatpush2.bf16.msra.mxu0 %v3357_v48  ;;  %v3453_v48 = vld [vmem:[%s3899_s28 + $0x6f0] ss:$8 sps:$4 sm:$0xff]  }
  0xf5   : > { %2345 = vmatpush2.bf16.msra.mxu1 %v3360_v49  ;;  %2303 = vmatprep.subr.bf16.mxu0 %v3365_v50  ;;  %v3456_v49 = vld [vmem:[%s3899_s28 + $0x7f0] ss:$8 sps:$4 sm:$0xff]   ;;  %v3461_v50 = vld [vmem:[%s3899_s28 + $0x6e4] ss:$8 sps:$4 sm:$0xff]  }
  0xf6   : > { %2346 = vmatprep.subr.bf16.mxu1 %v3368_v51  ;;  %v3464_v51 = vld [vmem:[%s3899_s28 + $0x7e4] ss:$8 sps:$4 sm:$0xff]  }
  0xf8   : > { %2304 = vmatpush2.bf16.msra.mxu0 %v3363_v52  ;;  %v3459_v52 = vld [vmem:[%s3899_s28 + $0x6e0] ss:$8 sps:$4 sm:$0xff]  }
  0xf9   : > { %2347 = vmatpush2.bf16.msra.mxu1 %v3366_v53  ;;  %2305 = vmatprep.subr.bf16.mxu0 %v3371_v54  ;;  %v3462_v53 = vld [vmem:[%s3899_s28 + $0x7e0] ss:$8 sps:$4 sm:$0xff]   ;;  %v3467_v54 = vld [vmem:[%s3899_s28 + $0x6d4] ss:$8 sps:$4 sm:$0xff]  }
  0xfa   : > { %2348 = vmatprep.subr.bf16.mxu1 %v3374_v55  ;;  %v3470_v55 = vld [vmem:[%s3899_s28 + $0x7d4] ss:$8 sps:$4 sm:$0xff]  }
  0xfc   : > { %2306 = vmatpush2.bf16.msra.mxu0 %v3369_v56  ;;  %v3465_v56 = vld [vmem:[%s3899_s28 + $0x6d0] ss:$8 sps:$4 sm:$0xff]  }
  0xfd   : > { %2349 = vmatpush2.bf16.msra.mxu1 %v3372_v57  ;;  %2307 = vmatprep.subr.bf16.mxu0 %v3377_v58  ;;  %v3468_v57 = vld [vmem:[%s3899_s28 + $0x7d0] ss:$8 sps:$4 sm:$0xff]   ;;  %v3473_v58 = vld [vmem:[%s3899_s28 + $0x6c4] ss:$8 sps:$4 sm:$0xff]  }
  0xfe   : > { %2350 = vmatprep.subr.bf16.mxu1 %v3380_v59  ;;  %v3476_v59 = vld [vmem:[%s3899_s28 + $0x7c4] ss:$8 sps:$4 sm:$0xff]  }
 0x100   : > { %2308 = vmatpush2.bf16.msra.mxu0 %v3375_v60  ;;  %v3471_v60 = vld [vmem:[%s3899_s28 + $0x6c0] ss:$8 sps:$4 sm:$0xff]  }
 0x101   : > { %2351 = vmatpush2.bf16.msra.mxu1 %v3378_v61  ;;  %2309 = vmatprep.subr.bf16.mxu0 %v3383_v62  ;;  %v3474_v61 = vld [vmem:[%s3899_s28 + $0x7c0] ss:$8 sps:$4 sm:$0xff]   ;;  %v3479_v62 = vld [vmem:[%s3899_s28 + $0x6b4] ss:$8 sps:$4 sm:$0xff]  }
 0x102   : > { %2352 = vmatprep.subr.bf16.mxu1 %v3386_v63  ;;  %v3482_v63 = vld [vmem:[%s3899_s28 + $0x7b4] ss:$8 sps:$4 sm:$0xff]  }
 0x104   : > { %2310 = vmatpush2.bf16.msra.mxu0 %v3381_v0  ;;  %v3477_v0 = vld [vmem:[%s3899_s28 + $0x6b0] ss:$8 sps:$4 sm:$0xff]  }
 0x105   : > { %2353 = vmatpush2.bf16.msra.mxu1 %v3384_v1  ;;  %2311 = vmatprep.subr.bf16.mxu0 %v3389_v2  ;;  %v3480_v1 = vld [vmem:[%s3899_s28 + $0x7b0] ss:$8 sps:$4 sm:$0xff]   ;;  %v3485_v2 = vld [vmem:[%s3899_s28 + $0x6a4] ss:$8 sps:$4 sm:$0xff]  }
 0x106   : > { %2354 = vmatprep.subr.bf16.mxu1 %v3392_v3  ;;  %v3488_v3 = vld [vmem:[%s3899_s28 + $0x7a4] ss:$8 sps:$4 sm:$0xff]  }
 0x108   : > { %2312 = vmatpush2.bf16.msra.mxu0 %v3387_v4  ;;  %v3483_v4 = vld [vmem:[%s3899_s28 + $0x6a0] ss:$8 sps:$4 sm:$0xff]  }
 0x109   : > { %2355 = vmatpush2.bf16.msra.mxu1 %v3390_v5  ;;  %2313 = vmatprep.subr.bf16.mxu0 %v3395_v6  ;;  %v3486_v5 = vld [vmem:[%s3899_s28 + $0x7a0] ss:$8 sps:$4 sm:$0xff]   ;;  %v3491_v6 = vld [vmem:[%s3899_s28 + $0x694] ss:$8 sps:$4 sm:$0xff]  }
 0x10a   : > { %2356 = vmatprep.subr.bf16.mxu1 %v3398_v7  ;;  %v3494_v7 = vld [vmem:[%s3899_s28 + $0x794] ss:$8 sps:$4 sm:$0xff]  }
 0x10c   : > { %2314 = vmatpush2.bf16.msra.mxu0 %v3393_v8  ;;  %v3489_v8 = vld [vmem:[%s3899_s28 + $0x690] ss:$8 sps:$4 sm:$0xff]  }
 0x10d   : > { %2357 = vmatpush2.bf16.msra.mxu1 %v3396_v9  ;;  %2369 = vmatprep.subr.bf16.mxu0 %v3404_v10  ;;  %v3492_v9 = vld [vmem:[%s3899_s28 + $0x790] ss:$8 sps:$4 sm:$0xff]   ;;  %v3497_v10 = vld [vmem:[%s3899_s28 + $0x684] ss:$8 sps:$4 sm:$0xff]  }
 0x10e   : > { %2412 = vmatprep.subr.bf16.mxu1 %v3410_v11  ;;  %v3500_v11 = vld [vmem:[%s3899_s28 + $0x784] ss:$8 sps:$4 sm:$0xff]  }
 0x10f   : > { %2316 = vmatmul.mubr.bf16.vlgmr.msra.gmra.mxu0 %v3399_v12  ;;  %v3495_v12 = vld [vmem:[%s3899_s28 + $0x680] ss:$8 sps:$4 sm:$0xff]  }
 0x110   : > { %2359 = vmatmul.mubr.bf16.vlgmr.msra.gmra.mxu1 %v3405_v14  ;;  %2370 = vmatpush1.bf16.msra.mxu0 %v3402_v13  ;;  %v3498_v13 = vld [vmem:[%s3899_s28 + $0x780] ss:$8 sps:$4 sm:$0xff]   ;;  %v3506_v14 = vld [vmem:[%s3899_s28 + $0x874] ss:$8 sps:$4 sm:$0xff]  }
 0x111   : > { %2413 = vmatpush1.bf16.msra.mxu1 %v3408_v15  ;;  %2371 = vmatprep.subr.bf16.mxu0 %v3413_v16  ;;  %v3501_v15 = vld [vmem:[#allocation3 + $0x30] ss:$72 sps:$4 sm:$0xff]  }
 0x112   : > { %2414 = vmatprep.subr.bf16.mxu1 %v3416_v17  ;;  %2401 = vmatprep.mubr.bf16.mxu0 %v3503_v18  ;;  %v3507_v16 = vld [vmem:[#allocation3 + $0x38] ss:$72 sps:$4 sm:$0xff]   ;;  %v3557_v18 = vld [vmem:[#allocation3 + $0x44] ss:$72 sps:$4 sm:$0xff]  }
 0x113   : > { %2444 = vmatprep.mubr.bf16.mxu1 %v3509_v19  ;;  %v3504_v17 = vld [vmem:[%s3899_s28 + $0x870] ss:$8 sps:$4 sm:$0xff]   ;;  %v3512_v19 = vld [vmem:[%s3899_s28 + $0x864] ss:$8 sps:$4 sm:$0xff]  }
 0x114   : > { %2372 = vmatpush1.bf16.msra.mxu0 %v3411_v20  ;;  %v3510_v20 = vld [vmem:[%s3899_s28 + $0x860] ss:$8 sps:$4 sm:$0xff]  }
 0x115   : > { %2415 = vmatpush1.bf16.msra.mxu1 %v3414_v21  ;;  %2373 = vmatprep.subr.bf16.mxu0 %v3419_v22  ;;  %v3515_v21 = vld [vmem:[%s3899_s28 + $0x854] ss:$8 sps:$4 sm:$0xff]   ;;  %v3513_v22 = vld [vmem:[%s3899_s28 + $0x850] ss:$8 sps:$4 sm:$0xff]  }
 0x116   : > { %2416 = vmatprep.subr.bf16.mxu1 %v3422_v23  ;;  %v3518_v23 = vld [vmem:[%s3899_s28 + $0x844] ss:$8 sps:$4 sm:$0xff]  }
 0x118   : > { %2374 = vmatpush1.bf16.msra.mxu0 %v3417_v24  ;;  %v3516_v24 = vld [vmem:[%s3899_s28 + $0x840] ss:$8 sps:$4 sm:$0xff]  }
 0x119   : > { %2417 = vmatpush1.bf16.msra.mxu1 %v3420_v25  ;;  %2375 = vmatprep.subr.bf16.mxu0 %v3425_v26  ;;  %v3521_v25 = vld [vmem:[%s3899_s28 + $0x834] ss:$8 sps:$4 sm:$0xff]   ;;  %v3519_v26 = vld [vmem:[%s3899_s28 + $0x830] ss:$8 sps:$4 sm:$0xff]  }
 0x11a   : > { %2418 = vmatprep.subr.bf16.mxu1 %v3428_v27  ;;  %v3524_v27 = vld [vmem:[%s3899_s28 + $0x824] ss:$8 sps:$4 sm:$0xff]  }
 0x11c   : > { %2376 = vmatpush1.bf16.msra.mxu0 %v3423_v28  ;;  %v3522_v28 = vld [vmem:[%s3899_s28 + $0x820] ss:$8 sps:$4 sm:$0xff]  }
 0x11d   : > { %2419 = vmatpush1.bf16.msra.mxu1 %v3426_v29  ;;  %2377 = vmatprep.subr.bf16.mxu0 %v3431_v30  ;;  %v3527_v29 = vld [vmem:[%s3899_s28 + $0x814] ss:$8 sps:$4 sm:$0xff]   ;;  %v3525_v30 = vld [vmem:[%s3899_s28 + $0x810] ss:$8 sps:$4 sm:$0xff]  }
 0x11e   : > { %2420 = vmatprep.subr.bf16.mxu1 %v3434_v31  ;;  %v3530_v31 = vld [vmem:[%s3899_s28 + $0x804] ss:$8 sps:$4 sm:$0xff]  }
 0x120   : > { %2378 = vmatpush1.bf16.msra.mxu0 %v3429_v32  ;;  %v3528_v32 = vld [vmem:[%s3899_s28 + $0x800] ss:$8 sps:$4 sm:$0xff]  }
 0x121   : > { %2421 = vmatpush1.bf16.msra.mxu1 %v3432_v33  ;;  %2379 = vmatprep.subr.bf16.mxu0 %v3437_v34  ;;  %v3533_v33 = vld [vmem:[%s3899_s28 + $0x8f4] ss:$8 sps:$4 sm:$0xff]   ;;  %v3531_v34 = vld [vmem:[%s3899_s28 + $0x8f0] ss:$8 sps:$4 sm:$0xff]  }
 0x122   : > { %2422 = vmatprep.subr.bf16.mxu1 %v3440_v35  ;;  %v3536_v35 = vld [vmem:[%s3899_s28 + $0x8e4] ss:$8 sps:$4 sm:$0xff]  }
 0x124   : > { %2380 = vmatpush1.bf16.msra.mxu0 %v3435_v36  ;;  %v3534_v36 = vld [vmem:[%s3899_s28 + $0x8e0] ss:$8 sps:$4 sm:$0xff]  }
 0x125   : > { %2423 = vmatpush1.bf16.msra.mxu1 %v3438_v37  ;;  %2381 = vmatprep.subr.bf16.mxu0 %v3443_v38  ;;  %v3539_v37 = vld [vmem:[%s3899_s28 + $0x8d4] ss:$8 sps:$4 sm:$0xff]   ;;  %v3537_v38 = vld [vmem:[%s3899_s28 + $0x8d0] ss:$8 sps:$4 sm:$0xff]  }
 0x126   : > { %2424 = vmatprep.subr.bf16.mxu1 %v3446_v39  ;;  %v3542_v39 = vld [vmem:[%s3899_s28 + $0x8c4] ss:$8 sps:$4 sm:$0xff]  }
 0x128   : > { %2382 = vmatpush1.bf16.msra.mxu0 %v3441_v40  ;;  %v3540_v40 = vld [vmem:[%s3899_s28 + $0x8c0] ss:$8 sps:$4 sm:$0xff]  }
 0x129   : > { %2425 = vmatpush1.bf16.msra.mxu1 %v3444_v41  ;;  %2383 = vmatprep.subr.bf16.mxu0 %v3449_v42  ;;  %v3545_v41 = vld [vmem:[%s3899_s28 + $0x8b4] ss:$8 sps:$4 sm:$0xff]   ;;  %v3543_v42 = vld [vmem:[%s3899_s28 + $0x8b0] ss:$8 sps:$4 sm:$0xff]  }
 0x12a   : > { %2426 = vmatprep.subr.bf16.mxu1 %v3452_v43  ;;  %v3548_v43 = vld [vmem:[%s3899_s28 + $0x8a4] ss:$8 sps:$4 sm:$0xff]  }
 0x12c   : > { %2384 = vmatpush1.bf16.msra.mxu0 %v3447_v44  ;;  %v3546_v44 = vld [vmem:[%s3899_s28 + $0x8a0] ss:$8 sps:$4 sm:$0xff]  }
 0x12d   : > { %2427 = vmatpush1.bf16.msra.mxu1 %v3450_v45  ;;  %2385 = vmatprep.subr.bf16.mxu0 %v3455_v46  ;;  %v3551_v45 = vld [vmem:[%s3899_s28 + $0x894] ss:$8 sps:$4 sm:$0xff]   ;;  %v3549_v46 = vld [vmem:[%s3899_s28 + $0x890] ss:$8 sps:$4 sm:$0xff]  }
 0x12e   : > { %2428 = vmatprep.subr.bf16.mxu1 %v3458_v47  ;;  %v3554_v47 = vld [vmem:[%s3899_s28 + $0x884] ss:$8 sps:$4 sm:$0xff]  }
 0x130   : > { %2386 = vmatpush2.bf16.msra.mxu0 %v3453_v48  ;;  %v3552_v48 = vld [vmem:[%s3899_s28 + $0x880] ss:$8 sps:$4 sm:$0xff]  }
 0x131   : > { %2429 = vmatpush2.bf16.msra.mxu1 %v3456_v49  ;;  %2387 = vmatprep.subr.bf16.mxu0 %v3461_v50  ;;  %v3555_v49 = vld [vmem:[#allocation3 + $0x40] ss:$72 sps:$4 sm:$0xff]  }
 0x132   : > { %2430 = vmatprep.subr.bf16.mxu1 %v3464_v51 }
 0x134   : > { %2388 = vmatpush2.bf16.msra.mxu0 %v3459_v52 }
 0x135   : > { %2431 = vmatpush2.bf16.msra.mxu1 %v3462_v53  ;;  %2389 = vmatprep.subr.bf16.mxu0 %v3467_v54 }
 0x136   : > { %2432 = vmatprep.subr.bf16.mxu1 %v3470_v55 }
 0x138   : > { %2390 = vmatpush2.bf16.msra.mxu0 %v3465_v56 }
 0x139   : > { %2433 = vmatpush2.bf16.msra.mxu1 %v3468_v57  ;;  %2391 = vmatprep.subr.bf16.mxu0 %v3473_v58 }
 0x13a   : > { %2434 = vmatprep.subr.bf16.mxu1 %v3476_v59 }
 0x13c   : > { %2392 = vmatpush2.bf16.msra.mxu0 %v3471_v60 }
 0x13d   : > { %2435 = vmatpush2.bf16.msra.mxu1 %v3474_v61  ;;  %2393 = vmatprep.subr.bf16.mxu0 %v3479_v62 }
 0x13e   : > { %2436 = vmatprep.subr.bf16.mxu1 %v3482_v63 }
 0x140   : > { %2394 = vmatpush2.bf16.msra.mxu0 %v3477_v0 }
 0x141   : > { %2437 = vmatpush2.bf16.msra.mxu1 %v3480_v1  ;;  %2395 = vmatprep.subr.bf16.mxu0 %v3485_v2 }
 0x142   : > { %2438 = vmatprep.subr.bf16.mxu1 %v3488_v3 }
 0x144   : > { %2396 = vmatpush2.bf16.msra.mxu0 %v3483_v4 }
 0x145   : > { %2439 = vmatpush2.bf16.msra.mxu1 %v3486_v5  ;;  %2397 = vmatprep.subr.bf16.mxu0 %v3491_v6 }
 0x146   : > { %2440 = vmatprep.subr.bf16.mxu1 %v3494_v7 }
 0x148   : > { %2398 = vmatpush2.bf16.msra.mxu0 %v3489_v8 }
 0x149   : > { %2441 = vmatpush2.bf16.msra.mxu1 %v3492_v9  ;;  %2399 = vmatprep.subr.bf16.mxu0 %v3497_v10 }
 0x14a   : > { %2442 = vmatprep.subr.bf16.mxu1 %v3500_v11 }
 0x14c   : > { %2400 = vmatpush2.bf16.msra.mxu0 %v3495_v12 }
 0x14d   : > { %2443 = vmatpush2.bf16.msra.mxu1 %v3498_v13  ;;  %2455 = vmatprep.subr.bf16.mxu0 %v3506_v14 }
 0x14f   : > { %2402 = vmatmul.mubr.bf16.vlgmr.msra.gmra.mxu0 %v3501_v15  ;;  %v2145_v50 = vpop.f32.mrf.mxu0 }
 0x150   : > { %2445 = vmatmul.mubr.bf16.vlgmr.msra.gmra.mxu1 %v3507_v16  ;;  %2456 = vmatpush1.bf16.msra.mxu0 %v3504_v17  ;;  %v2188_v51 = vpop.f32.mrf.mxu1 }
 0x151   : > { %2487 = vmatprep.mubr.bf16.mxu0 %v3557_v18  ;;  %2457 = vmatprep.subr.bf16.mxu0 %v3512_v19  ;;  %v2147_v52 = vpop.f32.mrf.mxu0  ;;  %v2189_v7 = vadd.f32 %v2188_v51, %v2145_v50  ;;  %v2515_v18 = vlaneseq }
 0x152   : > { %v2190_v53 = vpop.f32.mrf.mxu1 }
 0x153   : > { %v2149_v54 = vpop.f32.mrf.mxu0  ;;  %v2191_v8 = vadd.f32 %v2190_v53, %v2147_v52 }
 0x154   : > { %2458 = vmatpush1.bf16.msra.mxu0 %v3510_v20  ;;  %v2192_v55 = vpop.f32.mrf.mxu1 }
 0x155   : > { %2459 = vmatprep.subr.bf16.mxu0 %v3515_v21  ;;  %v2151_v56 = vpop.f32.mrf.mxu0  ;;  %v2193_v12 = vadd.f32 %v2192_v55, %v2149_v54 }
 0x156   : > { %v2194_v58 = vpop.f32.mrf.mxu1 }
 0x157   : > { %v2195_v15 = vadd.f32 %v2194_v58, %v2151_v56 }
 0x158   : > { %2460 = vmatpush1.bf16.msra.mxu0 %v3513_v22 }
 0x159   : > { %2461 = vmatprep.subr.bf16.mxu0 %v3518_v23 }
 0x15c   : > { %2462 = vmatpush1.bf16.msra.mxu0 %v3516_v24 }
 0x15d   : > { %2463 = vmatprep.subr.bf16.mxu0 %v3521_v25 }
 0x160   : > { %2464 = vmatpush1.bf16.msra.mxu0 %v3519_v26 }
 0x161   : > { %2465 = vmatprep.subr.bf16.mxu0 %v3524_v27  ;;  %v2516_v27 = vshrl.u32 %v2515_v18, 7 }
 0x164   : > { %2466 = vmatpush1.bf16.msra.mxu0 %v3522_v28 }
 0x165   : > { %2467 = vmatprep.subr.bf16.mxu0 %v3527_v29 }
 0x168   : > { %2468 = vmatpush1.bf16.msra.mxu0 %v3525_v30 }
 0x169   : > { %2469 = vmatprep.subr.bf16.mxu0 %v3530_v31 }
 0x16c   : > { %2470 = vmatpush1.bf16.msra.mxu0 %v3528_v32 }
 0x16d   : > { %2471 = vmatprep.subr.bf16.mxu0 %v3533_v33 }
 0x170   : > { %2472 = vmatpush2.bf16.msra.mxu0 %v3531_v34 }
 0x171   : > { %2473 = vmatprep.subr.bf16.mxu0 %v3536_v35 }
 0x174   : > { %2474 = vmatpush2.bf16.msra.mxu0 %v3534_v36  ;;  %v2517_v36 = vsub.s32 0, %v2516_v27 }
 0x175   : > { %2475 = vmatprep.subr.bf16.mxu0 %v3539_v37  ;;  %v2513_v37 = vld [vmem:[%s228_s20] sm:$0x3] }
 0x178   : > { %2476 = vmatpush2.bf16.msra.mxu0 %v3537_v38 }
 0x179   : > { %2477 = vmatprep.subr.bf16.mxu0 %v3542_v39 }
 0x17c   : > { %2478 = vmatpush2.bf16.msra.mxu0 %v3540_v40  ;;  %v2521_v40 = vsub.s32 1, %v2516_v27 }
 0x17d   : > { %2479 = vmatprep.subr.bf16.mxu0 %v3545_v41 }
 0x17e   : > { %v2522_v51 = vrot.slane %v2513_v37, %v2521_v40 }
 0x180   : > { %2480 = vmatpush2.bf16.msra.mxu0 %v3543_v42 }
 0x181   : > { %2481 = vmatprep.subr.bf16.mxu0 %v3548_v43 }
 0x184   : > { %2482 = vmatpush2.bf16.msra.mxu0 %v3546_v44 }
 0x185   : > { %2483 = vmatprep.subr.bf16.mxu0 %v3551_v45 }
 0x188   : > { %2484 = vmatpush2.bf16.msra.mxu0 %v3549_v46  ;;  %v2518_v46 = vrot.slane %v2513_v37, %v2517_v36 }
 0x189   : > { %2485 = vmatprep.subr.bf16.mxu0 %v3554_v47 }
 0x18c   : > { %2486 = vmatpush2.bf16.msra.mxu0 %v3552_v48 }
 0x18f   : > { %2488 = vmatmul.mubr.bf16.vlgmr.msra.gmra.mxu0 %v3555_v49  ;;  %v2231_v57 = vpop.f32.mrf.mxu0 }
 0x190   : > { %v2274_v60 = vpop.f32.mrf.mxu1  ;;  %v2232_v9 = vadd.f32 %v2231_v57, %v2189_v7 }
 0x191   : > { %v2233_v59 = vpop.f32.mrf.mxu0 }
 0x192   : > { %v2276_v62 = vpop.f32.mrf.mxu1  ;;  %v2234_v13 = vadd.f32 %v2233_v59, %v2191_v8  ;;  %v2275_v16 = vadd.f32 %v2274_v60, %v2232_v9 }
 0x193   : > { %v2235_v61 = vpop.f32.mrf.mxu0 }
 0x194   : > { %v2278_v0 = vpop.f32.mrf.mxu1  ;;  %v2236_v17 = vadd.f32 %v2235_v61, %v2193_v12  ;;  %v2277_v20 = vadd.f32 %v2276_v62, %v2234_v13 }
 0x195   : > { %v2237_v63 = vpop.f32.mrf.mxu0 }
 0x196   : > { %v2280_v2 = vpop.f32.mrf.mxu1  ;;  %v2238_v21 = vadd.f32 %v2237_v63, %v2195_v15  ;;  %v2279_v25 = vadd.f32 %v2278_v0, %v2236_v17 }
 0x198   : > { %v2281_v28 = vadd.f32 %v2280_v2, %v2238_v21 }
 0x1cf   : > { %v2317_v1 = vpop.f32.mrf.mxu0 }
 0x1d0   : > { %v2360_v4 = vpop.f32.mrf.mxu1  ;;  %v2318_v22 = vadd.f32 %v2317_v1, %v2275_v16 }
 0x1d1   : > { %v2319_v3 = vpop.f32.mrf.mxu0 }
 0x1d2   : > { %v2362_v6 = vpop.f32.mrf.mxu1  ;;  %v2320_v26 = vadd.f32 %v2319_v3, %v2277_v20  ;;  %v2361_v29 = vadd.f32 %v2360_v4, %v2318_v22 }
 0x1d3   : > { %v2321_v5 = vpop.f32.mrf.mxu0 }
 0x1d4   : > { %v2364_v11 = vpop.f32.mrf.mxu1  ;;  %v2322_v30 = vadd.f32 %v2321_v5, %v2279_v25  ;;  %v2363_v33 = vadd.f32 %v2362_v6, %v2320_v26 }
 0x1d5   : > { %v2323_v10 = vpop.f32.mrf.mxu0 }
 0x1d6   : > { %v2366_v19 = vpop.f32.mrf.mxu1  ;;  %v2324_v34 = vadd.f32 %v2323_v10, %v2281_v28  ;;  %v2365_v38 = vadd.f32 %v2364_v11, %v2322_v30 }
 0x1d8   : > { %v2367_v43 = vadd.f32 %v2366_v19, %v2324_v34 }
 0x20f   : > { %v2403_v14 = vpop.f32.mrf.mxu0 }
 0x210   : > { %v2446_v24 = vpop.f32.mrf.mxu1  ;;  %v2404_v35 = vadd.f32 %v2403_v14, %v2361_v29 }
 0x211   : > { %v2405_v23 = vpop.f32.mrf.mxu0 }
 0x212   : > { %v2448_v32 = vpop.f32.mrf.mxu1  ;;  %v2406_v39 = vadd.f32 %v2405_v23, %v2363_v33  ;;  %v2447_v44 = vadd.f32 %v2446_v24, %v2404_v35 }
 0x213   : > { %v2407_v31 = vpop.f32.mrf.mxu0 }
 0x214   : > { %v2450_v42 = vpop.f32.mrf.mxu1  ;;  %v2408_v45 = vadd.f32 %v2407_v31, %v2365_v38  ;;  %v2449_v48 = vadd.f32 %v2448_v32, %v2406_v39 }
 0x215   : > { %v2409_v41 = vpop.f32.mrf.mxu0 }
 0x216   : > { %v2410_v49 = vadd.f32 %v2409_v41, %v2367_v43  ;;  %v2452_v52 = vpop.f32.mrf.mxu1  ;;  %v2451_v54 = vadd.f32 %v2450_v42, %v2408_v45 }
 0x218   : > { %v2453_v58 = vadd.f32 %v2452_v52, %v2410_v49 }
 0x24f   : > { %v2489_v47 = vpop.f32.mrf.mxu0 }
 0x250   : > { %v2490_v50 = vadd.f32 %v2489_v47, %v2447_v44 }
 0x251   : > { %v2491_v53 = vpop.f32.mrf.mxu0 }
 0x252   : > { %v2525_v55 = vadd.f32 %v2518_v46, %v2490_v50  ;;  %v2492_v56 = vadd.f32 %v2491_v53, %v2449_v48 }
 0x253   : > { %v2493_v57 = vpop.f32.mrf.mxu0 }
 0x254   : > { %v2526_v59 = vadd.f32 %v2522_v51, %v2492_v56  ;;  %v2494_v60 = vadd.f32 %v2493_v57, %v2451_v54  ;;  %v2529_v62 = vmax.f32 %v2525_v55, 0.0 }
 0x255   : > { %v2495_v61 = vpop.f32.mrf.mxu0 }
 0x256   : > { %v2530_v63 = vmax.f32 %v2526_v59, 0.0  ;;  %v2527_v0 = vadd.f32 %v2518_v46, %v2494_v60  ;;  %v2496_v1 = vadd.f32 %v2495_v61, %v2453_v58 }
 0x258   : > { %v3008_v2 = vpack.c.bf16 %v2530_v63, %v2529_v62  ;;  %v2528_v3 = vadd.f32 %v2522_v51, %v2496_v1  ;;  %v2531_v4 = vmax.f32 %v2527_v0, 0.0 }
 0x25a   : > { %2545 = vst [vmem:[%s255_s27] sm:$0xff] %v3008_v2  ;;  %v2532_v5 = vmax.f32 %v2528_v3, 0.0 }
 0x25c   : > { %v3009_v6 = vpack.c.bf16 %v2532_v5, %v2531_v4 }
 0x25e   : > { %2546 = vst [vmem:[%s255_s27 + $0x8] sm:$0xff] %v3009_v6 }
 0x25f   : > { %3653 = shalt.err (!%p3650_p6)
}
 0x260   : > { %s3654_s29 = scalar_lea.hbm %s4201_s8, 256  ;;  %s3658_s5 = scalar_lea.hbm %s4252_s3, 512 }
 0x261   : > { %p3655_p8 = scmp.ne.s32.totalorder %s4201_s8, %s3654_s29  ;;  %p3659_p11 = scmp.lt.s32.totalorder %s4201_s8, %s4252_s3 }
 0x262   : > { %p3660_p12 = scmp.lt.s32.totalorder %s3658_s5, %s3654_s29 }
 0x263   : > { %p3656_p5 = pnand %p3655_p8, %p4265_p10 }
 0x264   : > { %p3661_p13 = por %p3660_p12, %p3659_p11 }
 0x265   : > { %p3657_p9 = pneg %p3656_p5 }
 0x267   : > { %p3662_p7 = pnand %p3661_p13, %p3657_p9 }
 0x269   : > { %3665 = shalt.err (!%p3662_p7)
}
 0x26a   : > { %s3735_s27 = smov 128   ;;  %s3736_s19 = smov 256  }
 0x26b   : > { %s3737_s6 = smov 8  }
 0x26c   : > { %3021 = dma.vmem_to_hbm [thread:$0]  (%p4265_p10), %s4196_s10, 256, %s4201_s8, %s2548_s9, %s3735_s27, %s3736_s19, %s3737_s6  }
 0x26d PF: > { %s2576_s4 = sand.u32 1, %s3704_s12   ;;  %p4266_p2 = scmp.ne.s32.totalorder %s4259_s26, 0 }
 0x26e   : > { %p4267_p1 = scmp.ge.s32.totalorder %s3724_s17, 2  ;;  %s2577_s11 = scalar_lea.sflag [#allocation5], %s2576_s4 }
 0x270   : > { %p3035_p0 = pnand %p4267_p1, %p4266_p2 }
 0x272   : > { %p3036_p3 = pneg %p3035_p0 }
 0x274   : > { %3699 = dma.done.wait (%p3036_p3), %s2577_s11, 256  }
 0x275   : > { %3701 = vsyncadd (%p3036_p3), %s2577_s11, 4294967040  ;;  %s20_s17 = sadd.s32 1, %s3724_s17   ;;  %s4268_s12 = smov %s3708_s13 }
 0x276   : > { %p17_p4 = scmp.ge.s32.totalorder %s20_s17, 4   ;;  %s4269_s13 = smov %s3712_s14 }
 0x277   : > { %s4270_s14 = smov %s3806_s24  ;;  %s4271_s15 = smov %s3720_s16 }
 0x278   : > { %s4272_s16 = smov %s4274_s18  ;;  %19 = sbr.rel (!%p17_p4) target bundleno = 7 (0x7), region = 102 }
 0x27d   :  { %2582 = vsyncpa [#allocation4], 1 }
 0x27e   :  { %2584 = vsyncpa [#allocation4 + $0x1], 1 }
 0x27f   :  { %2585 = vsyncpa [#allocation7], 1 }
 0x280   :  { %2587 = vsyncpa [#allocation7 + $0x1], 1 }
 0x281   :  { %2588 = vsyncpa [#allocation5], 1 }
 0x282   :  { %2590 = vsyncpa [#allocation5 + $0x1], 1 }

</bundles_post_ra>
